<compile_context>
chip_gen: v5e
topology: v5e:2x2
jax: 0.10.0
libtpu: 0.0.40
codegen_flags: <defaults>
</compile_context>

<pallas_src>
import math

import jax
import jax.numpy as jnp
from jax import lax
from jax.experimental import pallas as pl
from jax.experimental.pallas import tpu as pltpu


def _round_up(x, m):
    return ((x + m - 1) // m) * m


# -----------------------------------------------------------------------------
# Fused kernel factory
# -----------------------------------------------------------------------------
def _make_fused_kernel(S, Bp, E, H, Op, n_layers, Vp):
    f32 = jnp.float32
    bf16 = jnp.bfloat16
    H2, H3 = 2 * H, 3 * H

    def kernel(*refs):
        # ---- unpack refs: inputs, outputs, scratch ---------------------------
        idx_ref, h0_ref, emb_ref = refs[0], refs[1], refs[2]
        pos = 3
        layer_refs = []
        for _ in range(n_layers):
            layer_refs.append(refs[pos:pos + 4])   # (w_ih_slab, w_hh_slab, bias_i, b_hn)
            pos += 4
        wout_ref, bout_ref = refs[pos], refs[pos + 1]
        out_ref, hn_ref = refs[pos + 2], refs[pos + 3]
        gi_ref, act_ref = refs[pos + 4], refs[pos + 5]

        # ---- Embedding lookup as a one-hot GEMM (128-lane, unmasked) ---------
        idx = idx_ref[...]                                         # (S*Bp, 1) int32
        lane = lax.broadcasted_iota(jnp.int32, (S * Bp, Vp), 1)
        onehot = (lane == idx).astype(bf16)                        # (S*Bp, Vp)
        layer_in = jnp.dot(onehot, emb_ref[...],
                           preferred_element_type=f32).astype(bf16)  # (S*Bp, E)

        # ---- Stacked GRU layers ----------------------------------------------
        for l in range(n_layers):
            wih_ref, whh_ref, bi_ref, bhn_ref = layer_refs[l]

            # Hoisted input projections for ALL timesteps: ONE fused 128-lane
            # GEMM per layer.  bias_i already folds b_ih(r,z,n) + b_hh(r,z).
            gi_ref[...] = jnp.dot(layer_in, wih_ref[...],
                                  preferred_element_type=f32) + bi_ref[...]

            whh = whh_ref[...]                                     # (H, 128) bf16
            b_hn = jnp.broadcast_to(bhn_ref[...], (Bp, H))         # hoisted broadcast

            # Sequential recurrence: one MXU push + one EUP sigmoid pass + one
            # tanh per step; static lane slices pick the r/z/n gate regions.
            def step(t, h, whh=whh, b_hn=b_hn):
                row = pl.multiple_of(t * Bp, Bp)
                gi = gi_ref[pl.ds(row, Bp), :]                     # (Bp, 128) one load
                gh = jnp.dot(h.astype(bf16), whh,
                             preferred_element_type=f32)           # (Bp, 128) one push
                sig = jax.nn.sigmoid(gi + gh)                      # r|z lanes used
                r = sig[:, 0:H]
                z = sig[:, H:H2]
                n = jnp.tanh(gi[:, H2:H3] + r * (gh[:, H2:H3] + b_hn))
                h_new = (1.0 - z) * n + z * h
                act_ref[pl.ds(row, Bp), :] = h_new
                return h_new

            h_final = lax.fori_loop(0, S, step, h0_ref[l], unroll=True)
            hn_ref[l] = h_final
            layer_in = act_ref[...].astype(bf16)                   # (S*Bp, H)

        # ---- Linear head (Op padded to 128 lanes) + LogSoftmax over dim 0 ----
        logits = jnp.dot(layer_in, wout_ref[...],
                         preferred_element_type=f32) + bout_ref[...]
        logits3 = logits.reshape(S, Bp, Op)
        m = jnp.max(logits3, axis=0, keepdims=True)
        e = jnp.exp(logits3 - m)
        out_ref[...] = (logits3 - m) - jnp.log(jnp.sum(e, axis=0, keepdims=True))

    return kernel


# -----------------------------------------------------------------------------
# Wrapper: pad batch/output lanes, call the fused kernel, slice padding off.
# -----------------------------------------------------------------------------
def gru_embedding_forward(x_idx, hidden, params, output_size):
    S, B, _ = x_idx.shape
    n_layers, _, H = hidden.shape
    Vp, E = params["emb_p"].shape
    Op = params["w_out_slab"].shape[1]
    Bp = _round_up(max(B, 8), 8)            # full sublane occupancy

    idx_p = jnp.zeros((S, Bp), jnp.int32).at[:, :B].set(x_idx[:, :, 0].astype(jnp.int32))
    idx_flat = idx_p.reshape(S * Bp, 1)
    h0_p = jnp.zeros((n_layers, Bp, H), jnp.float32).at[:, :B, :].set(hidden)

    layer_args = []
    for p in params["layers"]:
        layer_args += [p["w_ih_slab"], p["w_hh_slab"], p["bias_i"], p["b_hn"]]

    args = [idx_flat, h0_p, params["emb_p"], *layer_args,
            params["w_out_slab"], params["b_out_p"]]

    kernel = _make_fused_kernel(S, Bp, E, H, Op, n_layers, Vp)

    # Advisory cost estimate for the XLA scheduler.
    flops = 2 * S * Bp * Vp * E
    trans = S * Bp * Op
    for l in range(n_layers):
        In = E if l == 0 else H
        flops += 2 * S * Bp * In * 128          # hoisted input-projection GEMM
        flops += S * 2 * Bp * H * 128           # recurrent GEMMs
        trans += S * Bp * (128 + H)             # sigmoid + tanh per step
    flops += 2 * S * Bp * H * Op                # linear head
    in_bytes = sum(int(a.size) * a.dtype.itemsize for a in args)
    out_bytes = (S * Bp * Op + n_layers * Bp * H) * 4
    cost = pl.CostEstimate(flops=int(flops), transcendentals=int(trans),
                           bytes_accessed=int(in_bytes + out_bytes))

    out_p, hn_p = pl.pallas_call(
        kernel,
        out_shape=(
            jax.ShapeDtypeStruct((S, Bp, Op), jnp.float32),
            jax.ShapeDtypeStruct((n_layers, Bp, H), jnp.float32),
        ),
        in_specs=[pl.BlockSpec(memory_space=pltpu.MemorySpace.VMEM) for _ in args],
        out_specs=(pl.BlockSpec(memory_space=pltpu.MemorySpace.VMEM),
                   pl.BlockSpec(memory_space=pltpu.MemorySpace.VMEM)),
        scratch_shapes=[
            pltpu.VMEM((S * Bp, 128), jnp.float32),   # fused gi (r|z|n) for all timesteps
            pltpu.VMEM((S * Bp, H), jnp.float32),     # per-layer activations
        ],
        cost_estimate=cost,
    )(*args)

    return out_p[:, :B, :output_size], hn_p[:, :B, :]


# -----------------------------------------------------------------------------
# Parameter init: PyTorch-style weights (bf16-representable), plus the fused
# lane-padded slabs consumed by the kernel.
# -----------------------------------------------------------------------------
def init_params(key, vocab_size, embedding_size, hidden_size, output_size, n_layers):
    H = hidden_size
    k = 1.0 / math.sqrt(H)
    Vp = _round_up(vocab_size, 128)
    Op = _round_up(output_size, 128)
    f32, bf16 = jnp.float32, jnp.bfloat16

    key, k_emb = jax.random.split(key)
    emb = jax.random.normal(k_emb, (vocab_size, embedding_size), f32)
    emb = emb.astype(bf16).astype(f32)                       # bf16-representable
    emb_p = jnp.zeros((Vp, embedding_size), bf16).at[:vocab_size].set(emb.astype(bf16))

    layers = []
    for l in range(n_layers):
        In = embedding_size if l == 0 else H
        key, k1, k2, k3, k4 = jax.random.split(key, 5)
        w_ih = jax.random.uniform(k1, (3 * H, In), f32, -k, k).astype(bf16).astype(f32)
        w_hh = jax.random.uniform(k2, (3 * H, H), f32, -k, k).astype(bf16).astype(f32)
        b_ih = jax.random.uniform(k3, (3 * H,), f32, -k, k)
        b_hh = jax.random.uniform(k4, (3 * H,), f32, -k, k)

        # Kernel layout: fused per-gate slabs, lane-padded to 128.
        w_ih_slab = jnp.zeros((In, 128), bf16).at[:, :3 * H].set(w_ih.T.astype(bf16))
        w_hh_slab = jnp.zeros((H, 128), bf16).at[:, :3 * H].set(w_hh.T.astype(bf16))
        bias_i = jnp.zeros((1, 128), f32)
        bias_i = bias_i.at[0, 0:H].set(b_ih[0:H] + b_hh[0:H])          # r: b_ir + b_hr
        bias_i = bias_i.at[0, H:2 * H].set(b_ih[H:2 * H] + b_hh[H:2 * H])  # z: b_iz + b_hz
        bias_i = bias_i.at[0, 2 * H:3 * H].set(b_ih[2 * H:3 * H])      # n: b_in only
        b_hn = b_hh[2 * H:3 * H].reshape(1, H)

        layers.append(dict(
            # reference layout (per-gate, f32)
            w_ih_g=w_ih.reshape(3, H, In).transpose(0, 2, 1),
            w_hh_g=w_hh.reshape(3, H, H).transpose(0, 2, 1),
            b_ih_g=b_ih.reshape(3, 1, H),
            b_hh_g=b_hh.reshape(3, 1, H),
            # kernel layout (fused slabs)
            w_ih_slab=w_ih_slab, w_hh_slab=w_hh_slab,
            bias_i=bias_i, b_hn=b_hn,
        ))

    key, k5, k6 = jax.random.split(key, 3)
    w_out = jax.random.uniform(k5, (output_size, H), f32, -k, k).astype(bf16).astype(f32)
    b_out = jax.random.uniform(k6, (output_size,), f32, -k, k)
    w_out_slab = jnp.zeros((H, Op), bf16).at[:, :output_size].set(w_out.T.astype(bf16))
    b_out_p = jnp.zeros((1, Op), f32).at[0, :output_size].set(b_out)

    return {"emb": emb, "emb_p": emb_p, "layers": layers,
            "w_out": w_out, "b_out": b_out,
            "w_out_slab": w_out_slab, "b_out_p": b_out_p}


# -----------------------------------------------------------------------------
# Pure-JAX f32 reference (mirrors PyTorch GRU semantics) for correctness check
# -----------------------------------------------------------------------------
def reference_forward(x_idx, hidden, params, output_size):
    x = params["emb"][x_idx[:, :, 0]]                      # (S, B, E)
    layer_in = x
    h_finals = []
    for l, p in enumerate(params["layers"]):
        wih, whh = p["w_ih_g"], p["w_hh_g"]
        bih, bhh = p["b_ih_g"], p["b_hh_g"]
        h = hidden[l]
        outs = []
        for t in range(layer_in.shape[0]):
            xt = layer_in[t]
            r = jax.nn.sigmoid(xt @ wih[0] + bih[0] + h @ whh[0] + bhh[0])
            z = jax.nn.sigmoid(xt @ wih[1] + bih[1] + h @ whh[1] + bhh[1])
            n = jnp.tanh(xt @ wih[2] + bih[2] + r * (h @ whh[2] + bhh[2]))
            h = (1.0 - z) * n + z * h
            outs.append(h)
        layer_in = jnp.stack(outs, axis=0)
        h_finals.append(h)
    hn = jnp.stack(h_finals, axis=0)
    logits = layer_in @ params["w_out"].T + params["b_out"]
    m = jnp.max(logits, axis=0, keepdims=True)
    out = (logits - m) - jnp.log(jnp.sum(jnp.exp(logits - m), axis=0, keepdims=True))
    return out, hn


if __name__ == "__main__":
    S, B = 8, 2
    vocab_size, embedding_size, hidden_size, output_size, n_layers = 20, 16, 32, 10, 2

    key = jax.random.PRNGKey(0)
    kx, kp = jax.random.split(key)
    x_idx = jax.random.randint(kx, (S, B, 1), 0, vocab_size, dtype=jnp.int32)
    hidden = jnp.zeros((n_layers, B, hidden_size), jnp.float32)        # initHidden
    params = init_params(kp, vocab_size, embedding_size, hidden_size,
                         output_size, n_layers)

    fwd = jax.jit(gru_embedding_forward, static_argnames=("output_size",))
    out, hn = fwd(x_idx, hidden, params, output_size=output_size)
    jax.block_until_ready((out, hn))

    assert out.shape == (S, B, output_size)
    assert hn.shape == (n_layers, B, hidden_size)

    # bf16 matmul operands (f32 accumulation): allow a slightly looser tolerance
    # than a pure-f32 kernel; weights are shared bf16-representable values, so
    # the only difference vs the f32 reference is activation rounding.
    ref_out, ref_hn = reference_forward(x_idx, hidden, params, output_size)
    assert float(jnp.max(jnp.abs(out - ref_out))) < 1e-2
    assert float(jnp.max(jnp.abs(hn - ref_hn))) < 1e-2

    print("KERNEL_OK")
</pallas_src>

<mosaic_0001>
module attributes {stable_mosaic.version = 11 : i64} {
  func.func @kernel(%arg0: memref<64x1xi32, #tpu.memory_space<vmem>>, %arg1: memref<2x8x32xf32, #tpu.memory_space<vmem>>, %arg2: memref<128x16xbf16, #tpu.memory_space<vmem>>, %arg3: memref<16x128xbf16, #tpu.memory_space<vmem>>, %arg4: memref<32x128xbf16, #tpu.memory_space<vmem>>, %arg5: memref<1x128xf32, #tpu.memory_space<vmem>>, %arg6: memref<1x32xf32, #tpu.memory_space<vmem>>, %arg7: memref<32x128xbf16, #tpu.memory_space<vmem>>, %arg8: memref<32x128xbf16, #tpu.memory_space<vmem>>, %arg9: memref<1x128xf32, #tpu.memory_space<vmem>>, %arg10: memref<1x32xf32, #tpu.memory_space<vmem>>, %arg11: memref<32x128xbf16, #tpu.memory_space<vmem>>, %arg12: memref<1x128xf32, #tpu.memory_space<vmem>>, %arg13: memref<8x8x128xf32, #tpu.memory_space<vmem>>, %arg14: memref<2x8x32xf32, #tpu.memory_space<vmem>>, %arg15: memref<64x128xf32, #tpu.memory_space<vmem>>, %arg16: memref<64x32xf32, #tpu.memory_space<vmem>>) attributes {dimension_semantics = [], scalar_prefetch = 0 : i64, scratch_operands = 2 : i64, tpu.core_type = #tpu.core_type<tc>} {
    %c0 = arith.constant 0 : index
    %c0_0 = arith.constant 0 : index
    %0 = vector.load %arg0[%c0, %c0_0] : memref<64x1xi32, #tpu.memory_space<vmem>>, vector<64x1xi32>
    %1 = tpu.iota {dimensions = array<i32: 1>} : vector<64x128xi32>
    %2 = vector.broadcast %0 : vector<64x1xi32> to vector<64x128xi32>
    %3 = arith.cmpi eq, %1, %2 : vector<64x128xi32>
    %4 = arith.extui %3 : vector<64x128xi1> to vector<64x128xi32>
    %5 = arith.sitofp %4 : vector<64x128xi32> to vector<64x128xf32>
    %6 = arith.truncf %5 : vector<64x128xf32> to vector<64x128xbf16>
    %c0_1 = arith.constant 0 : index
    %c0_2 = arith.constant 0 : index
    %7 = vector.load %arg2[%c0_1, %c0_2] : memref<128x16xbf16, #tpu.memory_space<vmem>>, vector<128x16xbf16>
    %cst = arith.constant dense<0.000000e+00> : vector<64x16xf32>
    %8 = tpu.matmul %6, %7, %cst {dimension_numbers = #tpu.dot_dimension_numbers<[1], [0], [0], [1], [0, 0, 1, 1], [], []>} : vector<64x128xbf16>, vector<128x16xbf16>, vector<64x16xf32> -> vector<64x16xf32>
    %9 = arith.truncf %8 : vector<64x16xf32> to vector<64x16xbf16>
    %c0_3 = arith.constant 0 : index
    %c0_4 = arith.constant 0 : index
    %10 = vector.load %arg3[%c0_3, %c0_4] : memref<16x128xbf16, #tpu.memory_space<vmem>>, vector<16x128xbf16>
    %cst_5 = arith.constant dense<0.000000e+00> : vector<64x128xf32>
    %11 = tpu.matmul %9, %10, %cst_5 {dimension_numbers = #tpu.dot_dimension_numbers<[1], [0], [0], [1], [0, 0, 1, 1], [], []>} : vector<64x16xbf16>, vector<16x128xbf16>, vector<64x128xf32> -> vector<64x128xf32>
    %c0_6 = arith.constant 0 : index
    %c0_7 = arith.constant 0 : index
    %12 = vector.load %arg5[%c0_6, %c0_7] : memref<1x128xf32, #tpu.memory_space<vmem>>, vector<1x128xf32>
    %13 = vector.broadcast %12 : vector<1x128xf32> to vector<64x128xf32>
    %14 = arith.addf %11, %13 : vector<64x128xf32>
    %c0_8 = arith.constant 0 : index
    %c0_9 = arith.constant 0 : index
    %15 = vector.load %arg15[%c0_8, %c0_9] : memref<64x128xf32, #tpu.memory_space<vmem>>, vector<64x128xf32>
    tpu.vector_store %arg15[%c0_8, %c0_9], %14 {strides = array<i32>} : memref<64x128xf32, #tpu.memory_space<vmem>>, vector<64x128xf32>,
    %c0_10 = arith.constant 0 : index
    %c0_11 = arith.constant 0 : index
    %16 = vector.load %arg4[%c0_10, %c0_11] : memref<32x128xbf16, #tpu.memory_space<vmem>>, vector<32x128xbf16>
    %c0_12 = arith.constant 0 : index
    %c0_13 = arith.constant 0 : index
    %17 = vector.load %arg6[%c0_12, %c0_13] : memref<1x32xf32, #tpu.memory_space<vmem>>, vector<1x32xf32>
    %18 = vector.shape_cast %17 : vector<1x32xf32> to vector<1x32xf32>
    %19 = vector.broadcast %18 : vector<1x32xf32> to vector<8x32xf32>
    %c0_14 = arith.constant 0 : index
    %c0_15 = arith.constant 0 : index
    %c0_16 = arith.constant 0 : index
    %20 = vector.load %arg1[%c0_14, %c0_15, %c0_16] : memref<2x8x32xf32, #tpu.memory_space<vmem>>, vector<1x8x32xf32>
    %21 = vector.shape_cast %20 : vector<1x8x32xf32> to vector<8x32xf32>
    %c0_i32 = arith.constant 0 : i32
    %c8_i32 = arith.constant 8 : i32
    %22 = arith.muli %c0_i32, %c8_i32 : i32
    %23 = tpu.assume_multiple %22, 8 : i32
    %24 = arith.index_cast %23 : i32 to index
    %c0_17 = arith.constant 0 : index
    %25 = vector.load %arg15[%24, %c0_17] : memref<64x128xf32, #tpu.memory_space<vmem>>, vector<8x128xf32>
    %26 = arith.truncf %21 : vector<8x32xf32> to vector<8x32xbf16>
    %cst_18 = arith.constant dense<0.000000e+00> : vector<8x128xf32>
    %27 = tpu.matmul %26, %16, %cst_18 {dimension_numbers = #tpu.dot_dimension_numbers<[1], [0], [0], [1], [0, 0, 1, 1], [], []>} : vector<8x32xbf16>, vector<32x128xbf16>, vector<8x128xf32> -> vector<8x128xf32>
    %28 = arith.addf %25, %27 : vector<8x128xf32>
    %29 = arith.negf %28 : vector<8x128xf32>
    %30 = math.exp %29 : vector<8x128xf32>
    %cst_19 = arith.constant 1.000000e+00 : f32
    %31 = vector.broadcast %cst_19 : f32 to vector<8x128xf32>
    %32 = arith.addf %31, %30 : vector<8x128xf32>
    %33 = arith.divf %31, %32 : vector<8x128xf32>
    %34 = vector.extract_strided_slice %33 {offsets = [0, 0], sizes = [8, 32], strides = [1, 1]} : vector<8x128xf32> to vector<8x32xf32>
    %35 = vector.extract_strided_slice %33 {offsets = [0, 32], sizes = [8, 32], strides = [1, 1]} : vector<8x128xf32> to vector<8x32xf32>
    %36 = vector.extract_strided_slice %25 {offsets = [0, 64], sizes = [8, 32], strides = [1, 1]} : vector<8x128xf32> to vector<8x32xf32>
    %37 = vector.extract_strided_slice %27 {offsets = [0, 64], sizes = [8, 32], strides = [1, 1]} : vector<8x128xf32> to vector<8x32xf32>
    %38 = arith.addf %37, %19 : vector<8x32xf32>
    %39 = arith.mulf %34, %38 : vector<8x32xf32>
    %40 = arith.addf %36, %39 : vector<8x32xf32>
    %41 = math.tanh %40 : vector<8x32xf32>
    %cst_20 = arith.constant 1.000000e+00 : f32
    %42 = vector.broadcast %cst_20 : f32 to vector<8x32xf32>
    %43 = arith.subf %42, %35 : vector<8x32xf32>
    %44 = arith.mulf %43, %41 : vector<8x32xf32>
    %45 = arith.mulf %35, %21 : vector<8x32xf32>
    %46 = arith.addf %44, %45 : vector<8x32xf32>
    %47 = arith.index_cast %23 : i32 to index
    %c0_21 = arith.constant 0 : index
    %48 = vector.load %arg16[%47, %c0_21] : memref<64x32xf32, #tpu.memory_space<vmem>>, vector<8x32xf32>
    tpu.vector_store %arg16[%47, %c0_21], %46 {strides = array<i32>} : memref<64x32xf32, #tpu.memory_space<vmem>>, vector<8x32xf32>,
    %c1_i32 = arith.constant 1 : i32
    %c8_i32_22 = arith.constant 8 : i32
    %49 = arith.muli %c1_i32, %c8_i32_22 : i32
    %50 = tpu.assume_multiple %49, 8 : i32
    %51 = arith.index_cast %50 : i32 to index
    %c0_23 = arith.constant 0 : index
    %52 = vector.load %arg15[%51, %c0_23] : memref<64x128xf32, #tpu.memory_space<vmem>>, vector<8x128xf32>
    %53 = arith.truncf %46 : vector<8x32xf32> to vector<8x32xbf16>
    %cst_24 = arith.constant dense<0.000000e+00> : vector<8x128xf32>
    %54 = tpu.matmul %53, %16, %cst_24 {dimension_numbers = #tpu.dot_dimension_numbers<[1], [0], [0], [1], [0, 0, 1, 1], [], []>} : vector<8x32xbf16>, vector<32x128xbf16>, vector<8x128xf32> -> vector<8x128xf32>
    %55 = arith.addf %52, %54 : vector<8x128xf32>
    %56 = arith.negf %55 : vector<8x128xf32>
    %57 = math.exp %56 : vector<8x128xf32>
    %cst_25 = arith.constant 1.000000e+00 : f32
    %58 = vector.broadcast %cst_25 : f32 to vector<8x128xf32>
    %59 = arith.addf %58, %57 : vector<8x128xf32>
    %60 = arith.divf %58, %59 : vector<8x128xf32>
    %61 = vector.extract_strided_slice %60 {offsets = [0, 0], sizes = [8, 32], strides = [1, 1]} : vector<8x128xf32> to vector<8x32xf32>
    %62 = vector.extract_strided_slice %60 {offsets = [0, 32], sizes = [8, 32], strides = [1, 1]} : vector<8x128xf32> to vector<8x32xf32>
    %63 = vector.extract_strided_slice %52 {offsets = [0, 64], sizes = [8, 32], strides = [1, 1]} : vector<8x128xf32> to vector<8x32xf32>
    %64 = vector.extract_strided_slice %54 {offsets = [0, 64], sizes = [8, 32], strides = [1, 1]} : vector<8x128xf32> to vector<8x32xf32>
    %65 = arith.addf %64, %19 : vector<8x32xf32>
    %66 = arith.mulf %61, %65 : vector<8x32xf32>
    %67 = arith.addf %63, %66 : vector<8x32xf32>
    %68 = math.tanh %67 : vector<8x32xf32>
    %cst_26 = arith.constant 1.000000e+00 : f32
    %69 = vector.broadcast %cst_26 : f32 to vector<8x32xf32>
    %70 = arith.subf %69, %62 : vector<8x32xf32>
    %71 = arith.mulf %70, %68 : vector<8x32xf32>
    %72 = arith.mulf %62, %46 : vector<8x32xf32>
    %73 = arith.addf %71, %72 : vector<8x32xf32>
    %74 = arith.index_cast %50 : i32 to index
    %c0_27 = arith.constant 0 : index
    %75 = vector.load %arg16[%74, %c0_27] : memref<64x32xf32, #tpu.memory_space<vmem>>, vector<8x32xf32>
    tpu.vector_store %arg16[%74, %c0_27], %73 {strides = array<i32>} : memref<64x32xf32, #tpu.memory_space<vmem>>, vector<8x32xf32>,
    %c2_i32 = arith.constant 2 : i32
    %c8_i32_28 = arith.constant 8 : i32
    %76 = arith.muli %c2_i32, %c8_i32_28 : i32
    %77 = tpu.assume_multiple %76, 8 : i32
    %78 = arith.index_cast %77 : i32 to index
    %c0_29 = arith.constant 0 : index
    %79 = vector.load %arg15[%78, %c0_29] : memref<64x128xf32, #tpu.memory_space<vmem>>, vector<8x128xf32>
    %80 = arith.truncf %73 : vector<8x32xf32> to vector<8x32xbf16>
    %cst_30 = arith.constant dense<0.000000e+00> : vector<8x128xf32>
    %81 = tpu.matmul %80, %16, %cst_30 {dimension_numbers = #tpu.dot_dimension_numbers<[1], [0], [0], [1], [0, 0, 1, 1], [], []>} : vector<8x32xbf16>, vector<32x128xbf16>, vector<8x128xf32> -> vector<8x128xf32>
    %82 = arith.addf %79, %81 : vector<8x128xf32>
    %83 = arith.negf %82 : vector<8x128xf32>
    %84 = math.exp %83 : vector<8x128xf32>
    %cst_31 = arith.constant 1.000000e+00 : f32
    %85 = vector.broadcast %cst_31 : f32 to vector<8x128xf32>
    %86 = arith.addf %85, %84 : vector<8x128xf32>
    %87 = arith.divf %85, %86 : vector<8x128xf32>
    %88 = vector.extract_strided_slice %87 {offsets = [0, 0], sizes = [8, 32], strides = [1, 1]} : vector<8x128xf32> to vector<8x32xf32>
    %89 = vector.extract_strided_slice %87 {offsets = [0, 32], sizes = [8, 32], strides = [1, 1]} : vector<8x128xf32> to vector<8x32xf32>
    %90 = vector.extract_strided_slice %79 {offsets = [0, 64], sizes = [8, 32], strides = [1, 1]} : vector<8x128xf32> to vector<8x32xf32>
    %91 = vector.extract_strided_slice %81 {offsets = [0, 64], sizes = [8, 32], strides = [1, 1]} : vector<8x128xf32> to vector<8x32xf32>
    %92 = arith.addf %91, %19 : vector<8x32xf32>
    %93 = arith.mulf %88, %92 : vector<8x32xf32>
    %94 = arith.addf %90, %93 : vector<8x32xf32>
    %95 = math.tanh %94 : vector<8x32xf32>
    %cst_32 = arith.constant 1.000000e+00 : f32
    %96 = vector.broadcast %cst_32 : f32 to vector<8x32xf32>
    %97 = arith.subf %96, %89 : vector<8x32xf32>
    %98 = arith.mulf %97, %95 : vector<8x32xf32>
    %99 = arith.mulf %89, %73 : vector<8x32xf32>
    %100 = arith.addf %98, %99 : vector<8x32xf32>
    %101 = arith.index_cast %77 : i32 to index
    %c0_33 = arith.constant 0 : index
    %102 = vector.load %arg16[%101, %c0_33] : memref<64x32xf32, #tpu.memory_space<vmem>>, vector<8x32xf32>
    tpu.vector_store %arg16[%101, %c0_33], %100 {strides = array<i32>} : memref<64x32xf32, #tpu.memory_space<vmem>>, vector<8x32xf32>,
    %c3_i32 = arith.constant 3 : i32
    %c8_i32_34 = arith.constant 8 : i32
    %103 = arith.muli %c3_i32, %c8_i32_34 : i32
    %104 = tpu.assume_multiple %103, 8 : i32
    %105 = arith.index_cast %104 : i32 to index
    %c0_35 = arith.constant 0 : index
    %106 = vector.load %arg15[%105, %c0_35] : memref<64x128xf32, #tpu.memory_space<vmem>>, vector<8x128xf32>
    %107 = arith.truncf %100 : vector<8x32xf32> to vector<8x32xbf16>
    %cst_36 = arith.constant dense<0.000000e+00> : vector<8x128xf32>
    %108 = tpu.matmul %107, %16, %cst_36 {dimension_numbers = #tpu.dot_dimension_numbers<[1], [0], [0], [1], [0, 0, 1, 1], [], []>} : vector<8x32xbf16>, vector<32x128xbf16>, vector<8x128xf32> -> vector<8x128xf32>
    %109 = arith.addf %106, %108 : vector<8x128xf32>
    %110 = arith.negf %109 : vector<8x128xf32>
    %111 = math.exp %110 : vector<8x128xf32>
    %cst_37 = arith.constant 1.000000e+00 : f32
    %112 = vector.broadcast %cst_37 : f32 to vector<8x128xf32>
    %113 = arith.addf %112, %111 : vector<8x128xf32>
    %114 = arith.divf %112, %113 : vector<8x128xf32>
    %115 = vector.extract_strided_slice %114 {offsets = [0, 0], sizes = [8, 32], strides = [1, 1]} : vector<8x128xf32> to vector<8x32xf32>
    %116 = vector.extract_strided_slice %114 {offsets = [0, 32], sizes = [8, 32], strides = [1, 1]} : vector<8x128xf32> to vector<8x32xf32>
    %117 = vector.extract_strided_slice %106 {offsets = [0, 64], sizes = [8, 32], strides = [1, 1]} : vector<8x128xf32> to vector<8x32xf32>
    %118 = vector.extract_strided_slice %108 {offsets = [0, 64], sizes = [8, 32], strides = [1, 1]} : vector<8x128xf32> to vector<8x32xf32>
    %119 = arith.addf %118, %19 : vector<8x32xf32>
    %120 = arith.mulf %115, %119 : vector<8x32xf32>
    %121 = arith.addf %117, %120 : vector<8x32xf32>
    %122 = math.tanh %121 : vector<8x32xf32>
    %cst_38 = arith.constant 1.000000e+00 : f32
    %123 = vector.broadcast %cst_38 : f32 to vector<8x32xf32>
    %124 = arith.subf %123, %116 : vector<8x32xf32>
    %125 = arith.mulf %124, %122 : vector<8x32xf32>
    %126 = arith.mulf %116, %100 : vector<8x32xf32>
    %127 = arith.addf %125, %126 : vector<8x32xf32>
    %128 = arith.index_cast %104 : i32 to index
    %c0_39 = arith.constant 0 : index
    %129 = vector.load %arg16[%128, %c0_39] : memref<64x32xf32, #tpu.memory_space<vmem>>, vector<8x32xf32>
    tpu.vector_store %arg16[%128, %c0_39], %127 {strides = array<i32>} : memref<64x32xf32, #tpu.memory_space<vmem>>, vector<8x32xf32>,
    %c4_i32 = arith.constant 4 : i32
    %c8_i32_40 = arith.constant 8 : i32
    %130 = arith.muli %c4_i32, %c8_i32_40 : i32
    %131 = tpu.assume_multiple %130, 8 : i32
    %132 = arith.index_cast %131 : i32 to index
    %c0_41 = arith.constant 0 : index
    %133 = vector.load %arg15[%132, %c0_41] : memref<64x128xf32, #tpu.memory_space<vmem>>, vector<8x128xf32>
    %134 = arith.truncf %127 : vector<8x32xf32> to vector<8x32xbf16>
    %cst_42 = arith.constant dense<0.000000e+00> : vector<8x128xf32>
    %135 = tpu.matmul %134, %16, %cst_42 {dimension_numbers = #tpu.dot_dimension_numbers<[1], [0], [0], [1], [0, 0, 1, 1], [], []>} : vector<8x32xbf16>, vector<32x128xbf16>, vector<8x128xf32> -> vector<8x128xf32>
    %136 = arith.addf %133, %135 : vector<8x128xf32>
    %137 = arith.negf %136 : vector<8x128xf32>
    %138 = math.exp %137 : vector<8x128xf32>
    %cst_43 = arith.constant 1.000000e+00 : f32
    %139 = vector.broadcast %cst_43 : f32 to vector<8x128xf32>
    %140 = arith.addf %139, %138 : vector<8x128xf32>
    %141 = arith.divf %139, %140 : vector<8x128xf32>
    %142 = vector.extract_strided_slice %141 {offsets = [0, 0], sizes = [8, 32], strides = [1, 1]} : vector<8x128xf32> to vector<8x32xf32>
    %143 = vector.extract_strided_slice %141 {offsets = [0, 32], sizes = [8, 32], strides = [1, 1]} : vector<8x128xf32> to vector<8x32xf32>
    %144 = vector.extract_strided_slice %133 {offsets = [0, 64], sizes = [8, 32], strides = [1, 1]} : vector<8x128xf32> to vector<8x32xf32>
    %145 = vector.extract_strided_slice %135 {offsets = [0, 64], sizes = [8, 32], strides = [1, 1]} : vector<8x128xf32> to vector<8x32xf32>
    %146 = arith.addf %145, %19 : vector<8x32xf32>
    %147 = arith.mulf %142, %146 : vector<8x32xf32>
    %148 = arith.addf %144, %147 : vector<8x32xf32>
    %149 = math.tanh %148 : vector<8x32xf32>
    %cst_44 = arith.constant 1.000000e+00 : f32
    %150 = vector.broadcast %cst_44 : f32 to vector<8x32xf32>
    %151 = arith.subf %150, %143 : vector<8x32xf32>
    %152 = arith.mulf %151, %149 : vector<8x32xf32>
    %153 = arith.mulf %143, %127 : vector<8x32xf32>
    %154 = arith.addf %152, %153 : vector<8x32xf32>
    %155 = arith.index_cast %131 : i32 to index
    %c0_45 = arith.constant 0 : index
    %156 = vector.load %arg16[%155, %c0_45] : memref<64x32xf32, #tpu.memory_space<vmem>>, vector<8x32xf32>
    tpu.vector_store %arg16[%155, %c0_45], %154 {strides = array<i32>} : memref<64x32xf32, #tpu.memory_space<vmem>>, vector<8x32xf32>,
    %c5_i32 = arith.constant 5 : i32
    %c8_i32_46 = arith.constant 8 : i32
    %157 = arith.muli %c5_i32, %c8_i32_46 : i32
    %158 = tpu.assume_multiple %157, 8 : i32
    %159 = arith.index_cast %158 : i32 to index
    %c0_47 = arith.constant 0 : index
    %160 = vector.load %arg15[%159, %c0_47] : memref<64x128xf32, #tpu.memory_space<vmem>>, vector<8x128xf32>
    %161 = arith.truncf %154 : vector<8x32xf32> to vector<8x32xbf16>
    %cst_48 = arith.constant dense<0.000000e+00> : vector<8x128xf32>
    %162 = tpu.matmul %161, %16, %cst_48 {dimension_numbers = #tpu.dot_dimension_numbers<[1], [0], [0], [1], [0, 0, 1, 1], [], []>} : vector<8x32xbf16>, vector<32x128xbf16>, vector<8x128xf32> -> vector<8x128xf32>
    %163 = arith.addf %160, %162 : vector<8x128xf32>
    %164 = arith.negf %163 : vector<8x128xf32>
    %165 = math.exp %164 : vector<8x128xf32>
    %cst_49 = arith.constant 1.000000e+00 : f32
    %166 = vector.broadcast %cst_49 : f32 to vector<8x128xf32>
    %167 = arith.addf %166, %165 : vector<8x128xf32>
    %168 = arith.divf %166, %167 : vector<8x128xf32>
    %169 = vector.extract_strided_slice %168 {offsets = [0, 0], sizes = [8, 32], strides = [1, 1]} : vector<8x128xf32> to vector<8x32xf32>
    %170 = vector.extract_strided_slice %168 {offsets = [0, 32], sizes = [8, 32], strides = [1, 1]} : vector<8x128xf32> to vector<8x32xf32>
    %171 = vector.extract_strided_slice %160 {offsets = [0, 64], sizes = [8, 32], strides = [1, 1]} : vector<8x128xf32> to vector<8x32xf32>
    %172 = vector.extract_strided_slice %162 {offsets = [0, 64], sizes = [8, 32], strides = [1, 1]} : vector<8x128xf32> to vector<8x32xf32>
    %173 = arith.addf %172, %19 : vector<8x32xf32>
    %174 = arith.mulf %169, %173 : vector<8x32xf32>
    %175 = arith.addf %171, %174 : vector<8x32xf32>
    %176 = math.tanh %175 : vector<8x32xf32>
    %cst_50 = arith.constant 1.000000e+00 : f32
    %177 = vector.broadcast %cst_50 : f32 to vector<8x32xf32>
    %178 = arith.subf %177, %170 : vector<8x32xf32>
    %179 = arith.mulf %178, %176 : vector<8x32xf32>
    %180 = arith.mulf %170, %154 : vector<8x32xf32>
    %181 = arith.addf %179, %180 : vector<8x32xf32>
    %182 = arith.index_cast %158 : i32 to index
    %c0_51 = arith.constant 0 : index
    %183 = vector.load %arg16[%182, %c0_51] : memref<64x32xf32, #tpu.memory_space<vmem>>, vector<8x32xf32>
    tpu.vector_store %arg16[%182, %c0_51], %181 {strides = array<i32>} : memref<64x32xf32, #tpu.memory_space<vmem>>, vector<8x32xf32>,
    %c6_i32 = arith.constant 6 : i32
    %c8_i32_52 = arith.constant 8 : i32
    %184 = arith.muli %c6_i32, %c8_i32_52 : i32
    %185 = tpu.assume_multiple %184, 8 : i32
    %186 = arith.index_cast %185 : i32 to index
    %c0_53 = arith.constant 0 : index
    %187 = vector.load %arg15[%186, %c0_53] : memref<64x128xf32, #tpu.memory_space<vmem>>, vector<8x128xf32>
    %188 = arith.truncf %181 : vector<8x32xf32> to vector<8x32xbf16>
    %cst_54 = arith.constant dense<0.000000e+00> : vector<8x128xf32>
    %189 = tpu.matmul %188, %16, %cst_54 {dimension_numbers = #tpu.dot_dimension_numbers<[1], [0], [0], [1], [0, 0, 1, 1], [], []>} : vector<8x32xbf16>, vector<32x128xbf16>, vector<8x128xf32> -> vector<8x128xf32>
    %190 = arith.addf %187, %189 : vector<8x128xf32>
    %191 = arith.negf %190 : vector<8x128xf32>
    %192 = math.exp %191 : vector<8x128xf32>
    %cst_55 = arith.constant 1.000000e+00 : f32
    %193 = vector.broadcast %cst_55 : f32 to vector<8x128xf32>
    %194 = arith.addf %193, %192 : vector<8x128xf32>
    %195 = arith.divf %193, %194 : vector<8x128xf32>
    %196 = vector.extract_strided_slice %195 {offsets = [0, 0], sizes = [8, 32], strides = [1, 1]} : vector<8x128xf32> to vector<8x32xf32>
    %197 = vector.extract_strided_slice %195 {offsets = [0, 32], sizes = [8, 32], strides = [1, 1]} : vector<8x128xf32> to vector<8x32xf32>
    %198 = vector.extract_strided_slice %187 {offsets = [0, 64], sizes = [8, 32], strides = [1, 1]} : vector<8x128xf32> to vector<8x32xf32>
    %199 = vector.extract_strided_slice %189 {offsets = [0, 64], sizes = [8, 32], strides = [1, 1]} : vector<8x128xf32> to vector<8x32xf32>
    %200 = arith.addf %199, %19 : vector<8x32xf32>
    %201 = arith.mulf %196, %200 : vector<8x32xf32>
    %202 = arith.addf %198, %201 : vector<8x32xf32>
    %203 = math.tanh %202 : vector<8x32xf32>
    %cst_56 = arith.constant 1.000000e+00 : f32
    %204 = vector.broadcast %cst_56 : f32 to vector<8x32xf32>
    %205 = arith.subf %204, %197 : vector<8x32xf32>
    %206 = arith.mulf %205, %203 : vector<8x32xf32>
    %207 = arith.mulf %197, %181 : vector<8x32xf32>
    %208 = arith.addf %206, %207 : vector<8x32xf32>
    %209 = arith.index_cast %185 : i32 to index
    %c0_57 = arith.constant 0 : index
    %210 = vector.load %arg16[%209, %c0_57] : memref<64x32xf32, #tpu.memory_space<vmem>>, vector<8x32xf32>
    tpu.vector_store %arg16[%209, %c0_57], %208 {strides = array<i32>} : memref<64x32xf32, #tpu.memory_space<vmem>>, vector<8x32xf32>,
    %c7_i32 = arith.constant 7 : i32
    %c8_i32_58 = arith.constant 8 : i32
    %211 = arith.muli %c7_i32, %c8_i32_58 : i32
    %212 = tpu.assume_multiple %211, 8 : i32
    %213 = arith.index_cast %212 : i32 to index
    %c0_59 = arith.constant 0 : index
    %214 = vector.load %arg15[%213, %c0_59] : memref<64x128xf32, #tpu.memory_space<vmem>>, vector<8x128xf32>
    %215 = arith.truncf %208 : vector<8x32xf32> to vector<8x32xbf16>
    %cst_60 = arith.constant dense<0.000000e+00> : vector<8x128xf32>
    %216 = tpu.matmul %215, %16, %cst_60 {dimension_numbers = #tpu.dot_dimension_numbers<[1], [0], [0], [1], [0, 0, 1, 1], [], []>} : vector<8x32xbf16>, vector<32x128xbf16>, vector<8x128xf32> -> vector<8x128xf32>
    %217 = arith.addf %214, %216 : vector<8x128xf32>
    %218 = arith.negf %217 : vector<8x128xf32>
    %219 = math.exp %218 : vector<8x128xf32>
    %cst_61 = arith.constant 1.000000e+00 : f32
    %220 = vector.broadcast %cst_61 : f32 to vector<8x128xf32>
    %221 = arith.addf %220, %219 : vector<8x128xf32>
    %222 = arith.divf %220, %221 : vector<8x128xf32>
    %223 = vector.extract_strided_slice %222 {offsets = [0, 0], sizes = [8, 32], strides = [1, 1]} : vector<8x128xf32> to vector<8x32xf32>
    %224 = vector.extract_strided_slice %222 {offsets = [0, 32], sizes = [8, 32], strides = [1, 1]} : vector<8x128xf32> to vector<8x32xf32>
    %225 = vector.extract_strided_slice %214 {offsets = [0, 64], sizes = [8, 32], strides = [1, 1]} : vector<8x128xf32> to vector<8x32xf32>
    %226 = vector.extract_strided_slice %216 {offsets = [0, 64], sizes = [8, 32], strides = [1, 1]} : vector<8x128xf32> to vector<8x32xf32>
    %227 = arith.addf %226, %19 : vector<8x32xf32>
    %228 = arith.mulf %223, %227 : vector<8x32xf32>
    %229 = arith.addf %225, %228 : vector<8x32xf32>
    %230 = math.tanh %229 : vector<8x32xf32>
    %cst_62 = arith.constant 1.000000e+00 : f32
    %231 = vector.broadcast %cst_62 : f32 to vector<8x32xf32>
    %232 = arith.subf %231, %224 : vector<8x32xf32>
    %233 = arith.mulf %232, %230 : vector<8x32xf32>
    %234 = arith.mulf %224, %208 : vector<8x32xf32>
    %235 = arith.addf %233, %234 : vector<8x32xf32>
    %236 = arith.index_cast %212 : i32 to index
    %c0_63 = arith.constant 0 : index
    %237 = vector.load %arg16[%236, %c0_63] : memref<64x32xf32, #tpu.memory_space<vmem>>, vector<8x32xf32>
    tpu.vector_store %arg16[%236, %c0_63], %235 {strides = array<i32>} : memref<64x32xf32, #tpu.memory_space<vmem>>, vector<8x32xf32>,
    %c8_i32_64 = arith.constant 8 : i32
    %c0_65 = arith.constant 0 : index
    %c0_66 = arith.constant 0 : index
    %c0_67 = arith.constant 0 : index
    %238 = vector.load %arg14[%c0_65, %c0_66, %c0_67] : memref<2x8x32xf32, #tpu.memory_space<vmem>>, vector<1x8x32xf32>
    %239 = vector.shape_cast %238 : vector<1x8x32xf32> to vector<8x32xf32>
    %240 = vector.shape_cast %235 : vector<8x32xf32> to vector<1x8x32xf32>
    tpu.vector_store %arg14[%c0_65, %c0_66, %c0_67], %240 {strides = array<i32>} : memref<2x8x32xf32, #tpu.memory_space<vmem>>, vector<1x8x32xf32>,
    %c0_68 = arith.constant 0 : index
    %c0_69 = arith.constant 0 : index
    %241 = vector.load %arg16[%c0_68, %c0_69] : memref<64x32xf32, #tpu.memory_space<vmem>>, vector<64x32xf32>
    %242 = arith.truncf %241 : vector<64x32xf32> to vector<64x32xbf16>
    %c0_70 = arith.constant 0 : index
    %c0_71 = arith.constant 0 : index
    %243 = vector.load %arg7[%c0_70, %c0_71] : memref<32x128xbf16, #tpu.memory_space<vmem>>, vector<32x128xbf16>
    %cst_72 = arith.constant dense<0.000000e+00> : vector<64x128xf32>
    %244 = tpu.matmul %242, %243, %cst_72 {dimension_numbers = #tpu.dot_dimension_numbers<[1], [0], [0], [1], [0, 0, 1, 1], [], []>} : vector<64x32xbf16>, vector<32x128xbf16>, vector<64x128xf32> -> vector<64x128xf32>
    %c0_73 = arith.constant 0 : index
    %c0_74 = arith.constant 0 : index
    %245 = vector.load %arg9[%c0_73, %c0_74] : memref<1x128xf32, #tpu.memory_space<vmem>>, vector<1x128xf32>
    %246 = vector.broadcast %245 : vector<1x128xf32> to vector<64x128xf32>
    %247 = arith.addf %244, %246 : vector<64x128xf32>
    %c0_75 = arith.constant 0 : index
    %c0_76 = arith.constant 0 : index
    %248 = vector.load %arg15[%c0_75, %c0_76] : memref<64x128xf32, #tpu.memory_space<vmem>>, vector<64x128xf32>
    tpu.vector_store %arg15[%c0_75, %c0_76], %247 {strides = array<i32>} : memref<64x128xf32, #tpu.memory_space<vmem>>, vector<64x128xf32>,
    %c0_77 = arith.constant 0 : index
    %c0_78 = arith.constant 0 : index
    %249 = vector.load %arg8[%c0_77, %c0_78] : memref<32x128xbf16, #tpu.memory_space<vmem>>, vector<32x128xbf16>
    %c0_79 = arith.constant 0 : index
    %c0_80 = arith.constant 0 : index
    %250 = vector.load %arg10[%c0_79, %c0_80] : memref<1x32xf32, #tpu.memory_space<vmem>>, vector<1x32xf32>
    %251 = vector.shape_cast %250 : vector<1x32xf32> to vector<1x32xf32>
    %252 = vector.broadcast %251 : vector<1x32xf32> to vector<8x32xf32>
    %c1 = arith.constant 1 : index
    %c0_81 = arith.constant 0 : index
    %c0_82 = arith.constant 0 : index
    %253 = vector.load %arg1[%c1, %c0_81, %c0_82] : memref<2x8x32xf32, #tpu.memory_space<vmem>>, vector<1x8x32xf32>
    %254 = vector.shape_cast %253 : vector<1x8x32xf32> to vector<8x32xf32>
    %c0_i32_83 = arith.constant 0 : i32
    %c8_i32_84 = arith.constant 8 : i32
    %255 = arith.muli %c0_i32_83, %c8_i32_84 : i32
    %256 = tpu.assume_multiple %255, 8 : i32
    %257 = arith.index_cast %256 : i32 to index
    %c0_85 = arith.constant 0 : index
    %258 = vector.load %arg15[%257, %c0_85] : memref<64x128xf32, #tpu.memory_space<vmem>>, vector<8x128xf32>
    %259 = arith.truncf %254 : vector<8x32xf32> to vector<8x32xbf16>
    %cst_86 = arith.constant dense<0.000000e+00> : vector<8x128xf32>
    %260 = tpu.matmul %259, %249, %cst_86 {dimension_numbers = #tpu.dot_dimension_numbers<[1], [0], [0], [1], [0, 0, 1, 1], [], []>} : vector<8x32xbf16>, vector<32x128xbf16>, vector<8x128xf32> -> vector<8x128xf32>
    %261 = arith.addf %258, %260 : vector<8x128xf32>
    %262 = arith.negf %261 : vector<8x128xf32>
    %263 = math.exp %262 : vector<8x128xf32>
    %cst_87 = arith.constant 1.000000e+00 : f32
    %264 = vector.broadcast %cst_87 : f32 to vector<8x128xf32>
    %265 = arith.addf %264, %263 : vector<8x128xf32>
    %266 = arith.divf %264, %265 : vector<8x128xf32>
    %267 = vector.extract_strided_slice %266 {offsets = [0, 0], sizes = [8, 32], strides = [1, 1]} : vector<8x128xf32> to vector<8x32xf32>
    %268 = vector.extract_strided_slice %266 {offsets = [0, 32], sizes = [8, 32], strides = [1, 1]} : vector<8x128xf32> to vector<8x32xf32>
    %269 = vector.extract_strided_slice %258 {offsets = [0, 64], sizes = [8, 32], strides = [1, 1]} : vector<8x128xf32> to vector<8x32xf32>
    %270 = vector.extract_strided_slice %260 {offsets = [0, 64], sizes = [8, 32], strides = [1, 1]} : vector<8x128xf32> to vector<8x32xf32>
    %271 = arith.addf %270, %252 : vector<8x32xf32>
    %272 = arith.mulf %267, %271 : vector<8x32xf32>
    %273 = arith.addf %269, %272 : vector<8x32xf32>
    %274 = math.tanh %273 : vector<8x32xf32>
    %cst_88 = arith.constant 1.000000e+00 : f32
    %275 = vector.broadcast %cst_88 : f32 to vector<8x32xf32>
    %276 = arith.subf %275, %268 : vector<8x32xf32>
    %277 = arith.mulf %276, %274 : vector<8x32xf32>
    %278 = arith.mulf %268, %254 : vector<8x32xf32>
    %279 = arith.addf %277, %278 : vector<8x32xf32>
    %280 = arith.index_cast %256 : i32 to index
    %c0_89 = arith.constant 0 : index
    %281 = vector.load %arg16[%280, %c0_89] : memref<64x32xf32, #tpu.memory_space<vmem>>, vector<8x32xf32>
    tpu.vector_store %arg16[%280, %c0_89], %279 {strides = array<i32>} : memref<64x32xf32, #tpu.memory_space<vmem>>, vector<8x32xf32>,
    %c1_i32_90 = arith.constant 1 : i32
    %c8_i32_91 = arith.constant 8 : i32
    %282 = arith.muli %c1_i32_90, %c8_i32_91 : i32
    %283 = tpu.assume_multiple %282, 8 : i32
    %284 = arith.index_cast %283 : i32 to index
    %c0_92 = arith.constant 0 : index
    %285 = vector.load %arg15[%284, %c0_92] : memref<64x128xf32, #tpu.memory_space<vmem>>, vector<8x128xf32>
    %286 = arith.truncf %279 : vector<8x32xf32> to vector<8x32xbf16>
    %cst_93 = arith.constant dense<0.000000e+00> : vector<8x128xf32>
    %287 = tpu.matmul %286, %249, %cst_93 {dimension_numbers = #tpu.dot_dimension_numbers<[1], [0], [0], [1], [0, 0, 1, 1], [], []>} : vector<8x32xbf16>, vector<32x128xbf16>, vector<8x128xf32> -> vector<8x128xf32>
    %288 = arith.addf %285, %287 : vector<8x128xf32>
    %289 = arith.negf %288 : vector<8x128xf32>
    %290 = math.exp %289 : vector<8x128xf32>
    %cst_94 = arith.constant 1.000000e+00 : f32
    %291 = vector.broadcast %cst_94 : f32 to vector<8x128xf32>
    %292 = arith.addf %291, %290 : vector<8x128xf32>
    %293 = arith.divf %291, %292 : vector<8x128xf32>
    %294 = vector.extract_strided_slice %293 {offsets = [0, 0], sizes = [8, 32], strides = [1, 1]} : vector<8x128xf32> to vector<8x32xf32>
    %295 = vector.extract_strided_slice %293 {offsets = [0, 32], sizes = [8, 32], strides = [1, 1]} : vector<8x128xf32> to vector<8x32xf32>
    %296 = vector.extract_strided_slice %285 {offsets = [0, 64], sizes = [8, 32], strides = [1, 1]} : vector<8x128xf32> to vector<8x32xf32>
    %297 = vector.extract_strided_slice %287 {offsets = [0, 64], sizes = [8, 32], strides = [1, 1]} : vector<8x128xf32> to vector<8x32xf32>
    %298 = arith.addf %297, %252 : vector<8x32xf32>
    %299 = arith.mulf %294, %298 : vector<8x32xf32>
    %300 = arith.addf %296, %299 : vector<8x32xf32>
    %301 = math.tanh %300 : vector<8x32xf32>
    %cst_95 = arith.constant 1.000000e+00 : f32
    %302 = vector.broadcast %cst_95 : f32 to vector<8x32xf32>
    %303 = arith.subf %302, %295 : vector<8x32xf32>
    %304 = arith.mulf %303, %301 : vector<8x32xf32>
    %305 = arith.mulf %295, %279 : vector<8x32xf32>
    %306 = arith.addf %304, %305 : vector<8x32xf32>
    %307 = arith.index_cast %283 : i32 to index
    %c0_96 = arith.constant 0 : index
    %308 = vector.load %arg16[%307, %c0_96] : memref<64x32xf32, #tpu.memory_space<vmem>>, vector<8x32xf32>
    tpu.vector_store %arg16[%307, %c0_96], %306 {strides = array<i32>} : memref<64x32xf32, #tpu.memory_space<vmem>>, vector<8x32xf32>,
    %c2_i32_97 = arith.constant 2 : i32
    %c8_i32_98 = arith.constant 8 : i32
    %309 = arith.muli %c2_i32_97, %c8_i32_98 : i32
    %310 = tpu.assume_multiple %309, 8 : i32
    %311 = arith.index_cast %310 : i32 to index
    %c0_99 = arith.constant 0 : index
    %312 = vector.load %arg15[%311, %c0_99] : memref<64x128xf32, #tpu.memory_space<vmem>>, vector<8x128xf32>
    %313 = arith.truncf %306 : vector<8x32xf32> to vector<8x32xbf16>
    %cst_100 = arith.constant dense<0.000000e+00> : vector<8x128xf32>
    %314 = tpu.matmul %313, %249, %cst_100 {dimension_numbers = #tpu.dot_dimension_numbers<[1], [0], [0], [1], [0, 0, 1, 1], [], []>} : vector<8x32xbf16>, vector<32x128xbf16>, vector<8x128xf32> -> vector<8x128xf32>
    %315 = arith.addf %312, %314 : vector<8x128xf32>
    %316 = arith.negf %315 : vector<8x128xf32>
    %317 = math.exp %316 : vector<8x128xf32>
    %cst_101 = arith.constant 1.000000e+00 : f32
    %318 = vector.broadcast %cst_101 : f32 to vector<8x128xf32>
    %319 = arith.addf %318, %317 : vector<8x128xf32>
    %320 = arith.divf %318, %319 : vector<8x128xf32>
    %321 = vector.extract_strided_slice %320 {offsets = [0, 0], sizes = [8, 32], strides = [1, 1]} : vector<8x128xf32> to vector<8x32xf32>
    %322 = vector.extract_strided_slice %320 {offsets = [0, 32], sizes = [8, 32], strides = [1, 1]} : vector<8x128xf32> to vector<8x32xf32>
    %323 = vector.extract_strided_slice %312 {offsets = [0, 64], sizes = [8, 32], strides = [1, 1]} : vector<8x128xf32> to vector<8x32xf32>
    %324 = vector.extract_strided_slice %314 {offsets = [0, 64], sizes = [8, 32], strides = [1, 1]} : vector<8x128xf32> to vector<8x32xf32>
    %325 = arith.addf %324, %252 : vector<8x32xf32>
    %326 = arith.mulf %321, %325 : vector<8x32xf32>
    %327 = arith.addf %323, %326 : vector<8x32xf32>
    %328 = math.tanh %327 : vector<8x32xf32>
    %cst_102 = arith.constant 1.000000e+00 : f32
    %329 = vector.broadcast %cst_102 : f32 to vector<8x32xf32>
    %330 = arith.subf %329, %322 : vector<8x32xf32>
    %331 = arith.mulf %330, %328 : vector<8x32xf32>
    %332 = arith.mulf %322, %306 : vector<8x32xf32>
    %333 = arith.addf %331, %332 : vector<8x32xf32>
    %334 = arith.index_cast %310 : i32 to index
    %c0_103 = arith.constant 0 : index
    %335 = vector.load %arg16[%334, %c0_103] : memref<64x32xf32, #tpu.memory_space<vmem>>, vector<8x32xf32>
    tpu.vector_store %arg16[%334, %c0_103], %333 {strides = array<i32>} : memref<64x32xf32, #tpu.memory_space<vmem>>, vector<8x32xf32>,
    %c3_i32_104 = arith.constant 3 : i32
    %c8_i32_105 = arith.constant 8 : i32
    %336 = arith.muli %c3_i32_104, %c8_i32_105 : i32
    %337 = tpu.assume_multiple %336, 8 : i32
    %338 = arith.index_cast %337 : i32 to index
    %c0_106 = arith.constant 0 : index
    %339 = vector.load %arg15[%338, %c0_106] : memref<64x128xf32, #tpu.memory_space<vmem>>, vector<8x128xf32>
    %340 = arith.truncf %333 : vector<8x32xf32> to vector<8x32xbf16>
    %cst_107 = arith.constant dense<0.000000e+00> : vector<8x128xf32>
    %341 = tpu.matmul %340, %249, %cst_107 {dimension_numbers = #tpu.dot_dimension_numbers<[1], [0], [0], [1], [0, 0, 1, 1], [], []>} : vector<8x32xbf16>, vector<32x128xbf16>, vector<8x128xf32> -> vector<8x128xf32>
    %342 = arith.addf %339, %341 : vector<8x128xf32>
    %343 = arith.negf %342 : vector<8x128xf32>
    %344 = math.exp %343 : vector<8x128xf32>
    %cst_108 = arith.constant 1.000000e+00 : f32
    %345 = vector.broadcast %cst_108 : f32 to vector<8x128xf32>
    %346 = arith.addf %345, %344 : vector<8x128xf32>
    %347 = arith.divf %345, %346 : vector<8x128xf32>
    %348 = vector.extract_strided_slice %347 {offsets = [0, 0], sizes = [8, 32], strides = [1, 1]} : vector<8x128xf32> to vector<8x32xf32>
    %349 = vector.extract_strided_slice %347 {offsets = [0, 32], sizes = [8, 32], strides = [1, 1]} : vector<8x128xf32> to vector<8x32xf32>
    %350 = vector.extract_strided_slice %339 {offsets = [0, 64], sizes = [8, 32], strides = [1, 1]} : vector<8x128xf32> to vector<8x32xf32>
    %351 = vector.extract_strided_slice %341 {offsets = [0, 64], sizes = [8, 32], strides = [1, 1]} : vector<8x128xf32> to vector<8x32xf32>
    %352 = arith.addf %351, %252 : vector<8x32xf32>
    %353 = arith.mulf %348, %352 : vector<8x32xf32>
    %354 = arith.addf %350, %353 : vector<8x32xf32>
    %355 = math.tanh %354 : vector<8x32xf32>
    %cst_109 = arith.constant 1.000000e+00 : f32
    %356 = vector.broadcast %cst_109 : f32 to vector<8x32xf32>
    %357 = arith.subf %356, %349 : vector<8x32xf32>
    %358 = arith.mulf %357, %355 : vector<8x32xf32>
    %359 = arith.mulf %349, %333 : vector<8x32xf32>
    %360 = arith.addf %358, %359 : vector<8x32xf32>
    %361 = arith.index_cast %337 : i32 to index
    %c0_110 = arith.constant 0 : index
    %362 = vector.load %arg16[%361, %c0_110] : memref<64x32xf32, #tpu.memory_space<vmem>>, vector<8x32xf32>
    tpu.vector_store %arg16[%361, %c0_110], %360 {strides = array<i32>} : memref<64x32xf32, #tpu.memory_space<vmem>>, vector<8x32xf32>,
    %c4_i32_111 = arith.constant 4 : i32
    %c8_i32_112 = arith.constant 8 : i32
    %363 = arith.muli %c4_i32_111, %c8_i32_112 : i32
    %364 = tpu.assume_multiple %363, 8 : i32
    %365 = arith.index_cast %364 : i32 to index
    %c0_113 = arith.constant 0 : index
    %366 = vector.load %arg15[%365, %c0_113] : memref<64x128xf32, #tpu.memory_space<vmem>>, vector<8x128xf32>
    %367 = arith.truncf %360 : vector<8x32xf32> to vector<8x32xbf16>
    %cst_114 = arith.constant dense<0.000000e+00> : vector<8x128xf32>
    %368 = tpu.matmul %367, %249, %cst_114 {dimension_numbers = #tpu.dot_dimension_numbers<[1], [0], [0], [1], [0, 0, 1, 1], [], []>} : vector<8x32xbf16>, vector<32x128xbf16>, vector<8x128xf32> -> vector<8x128xf32>
    %369 = arith.addf %366, %368 : vector<8x128xf32>
    %370 = arith.negf %369 : vector<8x128xf32>
    %371 = math.exp %370 : vector<8x128xf32>
    %cst_115 = arith.constant 1.000000e+00 : f32
    %372 = vector.broadcast %cst_115 : f32 to vector<8x128xf32>
    %373 = arith.addf %372, %371 : vector<8x128xf32>
    %374 = arith.divf %372, %373 : vector<8x128xf32>
    %375 = vector.extract_strided_slice %374 {offsets = [0, 0], sizes = [8, 32], strides = [1, 1]} : vector<8x128xf32> to vector<8x32xf32>
    %376 = vector.extract_strided_slice %374 {offsets = [0, 32], sizes = [8, 32], strides = [1, 1]} : vector<8x128xf32> to vector<8x32xf32>
    %377 = vector.extract_strided_slice %366 {offsets = [0, 64], sizes = [8, 32], strides = [1, 1]} : vector<8x128xf32> to vector<8x32xf32>
    %378 = vector.extract_strided_slice %368 {offsets = [0, 64], sizes = [8, 32], strides = [1, 1]} : vector<8x128xf32> to vector<8x32xf32>
    %379 = arith.addf %378, %252 : vector<8x32xf32>
    %380 = arith.mulf %375, %379 : vector<8x32xf32>
    %381 = arith.addf %377, %380 : vector<8x32xf32>
    %382 = math.tanh %381 : vector<8x32xf32>
    %cst_116 = arith.constant 1.000000e+00 : f32
    %383 = vector.broadcast %cst_116 : f32 to vector<8x32xf32>
    %384 = arith.subf %383, %376 : vector<8x32xf32>
    %385 = arith.mulf %384, %382 : vector<8x32xf32>
    %386 = arith.mulf %376, %360 : vector<8x32xf32>
    %387 = arith.addf %385, %386 : vector<8x32xf32>
    %388 = arith.index_cast %364 : i32 to index
    %c0_117 = arith.constant 0 : index
    %389 = vector.load %arg16[%388, %c0_117] : memref<64x32xf32, #tpu.memory_space<vmem>>, vector<8x32xf32>
    tpu.vector_store %arg16[%388, %c0_117], %387 {strides = array<i32>} : memref<64x32xf32, #tpu.memory_space<vmem>>, vector<8x32xf32>,
    %c5_i32_118 = arith.constant 5 : i32
    %c8_i32_119 = arith.constant 8 : i32
    %390 = arith.muli %c5_i32_118, %c8_i32_119 : i32
    %391 = tpu.assume_multiple %390, 8 : i32
    %392 = arith.index_cast %391 : i32 to index
    %c0_120 = arith.constant 0 : index
    %393 = vector.load %arg15[%392, %c0_120] : memref<64x128xf32, #tpu.memory_space<vmem>>, vector<8x128xf32>
    %394 = arith.truncf %387 : vector<8x32xf32> to vector<8x32xbf16>
    %cst_121 = arith.constant dense<0.000000e+00> : vector<8x128xf32>
    %395 = tpu.matmul %394, %249, %cst_121 {dimension_numbers = #tpu.dot_dimension_numbers<[1], [0], [0], [1], [0, 0, 1, 1], [], []>} : vector<8x32xbf16>, vector<32x128xbf16>, vector<8x128xf32> -> vector<8x128xf32>
    %396 = arith.addf %393, %395 : vector<8x128xf32>
    %397 = arith.negf %396 : vector<8x128xf32>
    %398 = math.exp %397 : vector<8x128xf32>
    %cst_122 = arith.constant 1.000000e+00 : f32
    %399 = vector.broadcast %cst_122 : f32 to vector<8x128xf32>
    %400 = arith.addf %399, %398 : vector<8x128xf32>
    %401 = arith.divf %399, %400 : vector<8x128xf32>
    %402 = vector.extract_strided_slice %401 {offsets = [0, 0], sizes = [8, 32], strides = [1, 1]} : vector<8x128xf32> to vector<8x32xf32>
    %403 = vector.extract_strided_slice %401 {offsets = [0, 32], sizes = [8, 32], strides = [1, 1]} : vector<8x128xf32> to vector<8x32xf32>
    %404 = vector.extract_strided_slice %393 {offsets = [0, 64], sizes = [8, 32], strides = [1, 1]} : vector<8x128xf32> to vector<8x32xf32>
    %405 = vector.extract_strided_slice %395 {offsets = [0, 64], sizes = [8, 32], strides = [1, 1]} : vector<8x128xf32> to vector<8x32xf32>
    %406 = arith.addf %405, %252 : vector<8x32xf32>
    %407 = arith.mulf %402, %406 : vector<8x32xf32>
    %408 = arith.addf %404, %407 : vector<8x32xf32>
    %409 = math.tanh %408 : vector<8x32xf32>
    %cst_123 = arith.constant 1.000000e+00 : f32
    %410 = vector.broadcast %cst_123 : f32 to vector<8x32xf32>
    %411 = arith.subf %410, %403 : vector<8x32xf32>
    %412 = arith.mulf %411, %409 : vector<8x32xf32>
    %413 = arith.mulf %403, %387 : vector<8x32xf32>
    %414 = arith.addf %412, %413 : vector<8x32xf32>
    %415 = arith.index_cast %391 : i32 to index
    %c0_124 = arith.constant 0 : index
    %416 = vector.load %arg16[%415, %c0_124] : memref<64x32xf32, #tpu.memory_space<vmem>>, vector<8x32xf32>
    tpu.vector_store %arg16[%415, %c0_124], %414 {strides = array<i32>} : memref<64x32xf32, #tpu.memory_space<vmem>>, vector<8x32xf32>,
    %c6_i32_125 = arith.constant 6 : i32
    %c8_i32_126 = arith.constant 8 : i32
    %417 = arith.muli %c6_i32_125, %c8_i32_126 : i32
    %418 = tpu.assume_multiple %417, 8 : i32
    %419 = arith.index_cast %418 : i32 to index
    %c0_127 = arith.constant 0 : index
    %420 = vector.load %arg15[%419, %c0_127] : memref<64x128xf32, #tpu.memory_space<vmem>>, vector<8x128xf32>
    %421 = arith.truncf %414 : vector<8x32xf32> to vector<8x32xbf16>
    %cst_128 = arith.constant dense<0.000000e+00> : vector<8x128xf32>
    %422 = tpu.matmul %421, %249, %cst_128 {dimension_numbers = #tpu.dot_dimension_numbers<[1], [0], [0], [1], [0, 0, 1, 1], [], []>} : vector<8x32xbf16>, vector<32x128xbf16>, vector<8x128xf32> -> vector<8x128xf32>
    %423 = arith.addf %420, %422 : vector<8x128xf32>
    %424 = arith.negf %423 : vector<8x128xf32>
    %425 = math.exp %424 : vector<8x128xf32>
    %cst_129 = arith.constant 1.000000e+00 : f32
    %426 = vector.broadcast %cst_129 : f32 to vector<8x128xf32>
    %427 = arith.addf %426, %425 : vector<8x128xf32>
    %428 = arith.divf %426, %427 : vector<8x128xf32>
    %429 = vector.extract_strided_slice %428 {offsets = [0, 0], sizes = [8, 32], strides = [1, 1]} : vector<8x128xf32> to vector<8x32xf32>
    %430 = vector.extract_strided_slice %428 {offsets = [0, 32], sizes = [8, 32], strides = [1, 1]} : vector<8x128xf32> to vector<8x32xf32>
    %431 = vector.extract_strided_slice %420 {offsets = [0, 64], sizes = [8, 32], strides = [1, 1]} : vector<8x128xf32> to vector<8x32xf32>
    %432 = vector.extract_strided_slice %422 {offsets = [0, 64], sizes = [8, 32], strides = [1, 1]} : vector<8x128xf32> to vector<8x32xf32>
    %433 = arith.addf %432, %252 : vector<8x32xf32>
    %434 = arith.mulf %429, %433 : vector<8x32xf32>
    %435 = arith.addf %431, %434 : vector<8x32xf32>
    %436 = math.tanh %435 : vector<8x32xf32>
    %cst_130 = arith.constant 1.000000e+00 : f32
    %437 = vector.broadcast %cst_130 : f32 to vector<8x32xf32>
    %438 = arith.subf %437, %430 : vector<8x32xf32>
    %439 = arith.mulf %438, %436 : vector<8x32xf32>
    %440 = arith.mulf %430, %414 : vector<8x32xf32>
    %441 = arith.addf %439, %440 : vector<8x32xf32>
    %442 = arith.index_cast %418 : i32 to index
    %c0_131 = arith.constant 0 : index
    %443 = vector.load %arg16[%442, %c0_131] : memref<64x32xf32, #tpu.memory_space<vmem>>, vector<8x32xf32>
    tpu.vector_store %arg16[%442, %c0_131], %441 {strides = array<i32>} : memref<64x32xf32, #tpu.memory_space<vmem>>, vector<8x32xf32>,
    %c7_i32_132 = arith.constant 7 : i32
    %c8_i32_133 = arith.constant 8 : i32
    %444 = arith.muli %c7_i32_132, %c8_i32_133 : i32
    %445 = tpu.assume_multiple %444, 8 : i32
    %446 = arith.index_cast %445 : i32 to index
    %c0_134 = arith.constant 0 : index
    %447 = vector.load %arg15[%446, %c0_134] : memref<64x128xf32, #tpu.memory_space<vmem>>, vector<8x128xf32>
    %448 = arith.truncf %441 : vector<8x32xf32> to vector<8x32xbf16>
    %cst_135 = arith.constant dense<0.000000e+00> : vector<8x128xf32>
    %449 = tpu.matmul %448, %249, %cst_135 {dimension_numbers = #tpu.dot_dimension_numbers<[1], [0], [0], [1], [0, 0, 1, 1], [], []>} : vector<8x32xbf16>, vector<32x128xbf16>, vector<8x128xf32> -> vector<8x128xf32>
    %450 = arith.addf %447, %449 : vector<8x128xf32>
    %451 = arith.negf %450 : vector<8x128xf32>
    %452 = math.exp %451 : vector<8x128xf32>
    %cst_136 = arith.constant 1.000000e+00 : f32
    %453 = vector.broadcast %cst_136 : f32 to vector<8x128xf32>
    %454 = arith.addf %453, %452 : vector<8x128xf32>
    %455 = arith.divf %453, %454 : vector<8x128xf32>
    %456 = vector.extract_strided_slice %455 {offsets = [0, 0], sizes = [8, 32], strides = [1, 1]} : vector<8x128xf32> to vector<8x32xf32>
    %457 = vector.extract_strided_slice %455 {offsets = [0, 32], sizes = [8, 32], strides = [1, 1]} : vector<8x128xf32> to vector<8x32xf32>
    %458 = vector.extract_strided_slice %447 {offsets = [0, 64], sizes = [8, 32], strides = [1, 1]} : vector<8x128xf32> to vector<8x32xf32>
    %459 = vector.extract_strided_slice %449 {offsets = [0, 64], sizes = [8, 32], strides = [1, 1]} : vector<8x128xf32> to vector<8x32xf32>
    %460 = arith.addf %459, %252 : vector<8x32xf32>
    %461 = arith.mulf %456, %460 : vector<8x32xf32>
    %462 = arith.addf %458, %461 : vector<8x32xf32>
    %463 = math.tanh %462 : vector<8x32xf32>
    %cst_137 = arith.constant 1.000000e+00 : f32
    %464 = vector.broadcast %cst_137 : f32 to vector<8x32xf32>
    %465 = arith.subf %464, %457 : vector<8x32xf32>
    %466 = arith.mulf %465, %463 : vector<8x32xf32>
    %467 = arith.mulf %457, %441 : vector<8x32xf32>
    %468 = arith.addf %466, %467 : vector<8x32xf32>
    %469 = arith.index_cast %445 : i32 to index
    %c0_138 = arith.constant 0 : index
    %470 = vector.load %arg16[%469, %c0_138] : memref<64x32xf32, #tpu.memory_space<vmem>>, vector<8x32xf32>
    tpu.vector_store %arg16[%469, %c0_138], %468 {strides = array<i32>} : memref<64x32xf32, #tpu.memory_space<vmem>>, vector<8x32xf32>,
    %c8_i32_139 = arith.constant 8 : i32
    %c1_140 = arith.constant 1 : index
    %c0_141 = arith.constant 0 : index
    %c0_142 = arith.constant 0 : index
    %471 = vector.load %arg14[%c1_140, %c0_141, %c0_142] : memref<2x8x32xf32, #tpu.memory_space<vmem>>, vector<1x8x32xf32>
    %472 = vector.shape_cast %471 : vector<1x8x32xf32> to vector<8x32xf32>
    %473 = vector.shape_cast %468 : vector<8x32xf32> to vector<1x8x32xf32>
    tpu.vector_store %arg14[%c1_140, %c0_141, %c0_142], %473 {strides = array<i32>} : memref<2x8x32xf32, #tpu.memory_space<vmem>>, vector<1x8x32xf32>,
    %c0_143 = arith.constant 0 : index
    %c0_144 = arith.constant 0 : index
    %474 = vector.load %arg16[%c0_143, %c0_144] : memref<64x32xf32, #tpu.memory_space<vmem>>, vector<64x32xf32>
    %475 = arith.truncf %474 : vector<64x32xf32> to vector<64x32xbf16>
    %c0_145 = arith.constant 0 : index
    %c0_146 = arith.constant 0 : index
    %476 = vector.load %arg11[%c0_145, %c0_146] : memref<32x128xbf16, #tpu.memory_space<vmem>>, vector<32x128xbf16>
    %cst_147 = arith.constant dense<0.000000e+00> : vector<64x128xf32>
    %477 = tpu.matmul %475, %476, %cst_147 {dimension_numbers = #tpu.dot_dimension_numbers<[1], [0], [0], [1], [0, 0, 1, 1], [], []>} : vector<64x32xbf16>, vector<32x128xbf16>, vector<64x128xf32> -> vector<64x128xf32>
    %c0_148 = arith.constant 0 : index
    %c0_149 = arith.constant 0 : index
    %478 = vector.load %arg12[%c0_148, %c0_149] : memref<1x128xf32, #tpu.memory_space<vmem>>, vector<1x128xf32>
    %479 = vector.broadcast %478 : vector<1x128xf32> to vector<64x128xf32>
    %480 = arith.addf %477, %479 : vector<64x128xf32>
    %481 = vector.shape_cast %480 : vector<64x128xf32> to vector<8x8x128xf32>
    %cst_150 = arith.constant dense<0xFF800000> : vector<8x128xf32>
    %482 = vector.multi_reduction <maximumf>, %481, %cst_150 [0] : vector<8x8x128xf32> to vector<8x128xf32>
    %483 = vector.shape_cast %482 : vector<8x128xf32> to vector<1x8x128xf32>
    %484 = vector.broadcast %483 : vector<1x8x128xf32> to vector<8x8x128xf32>
    %485 = arith.subf %481, %484 : vector<8x8x128xf32>
    %486 = math.exp %485 : vector<8x8x128xf32>
    %487 = vector.broadcast %483 : vector<1x8x128xf32> to vector<8x8x128xf32>
    %488 = arith.subf %481, %487 : vector<8x8x128xf32>
    %cst_151 = arith.constant dense<0.000000e+00> : vector<8x128xf32>
    %489 = vector.multi_reduction <add>, %486, %cst_151 [0] : vector<8x8x128xf32> to vector<8x128xf32>
    %490 = vector.shape_cast %489 : vector<8x128xf32> to vector<1x8x128xf32>
    %491 = math.log %490 : vector<1x8x128xf32>
    %492 = vector.broadcast %491 : vector<1x8x128xf32> to vector<8x8x128xf32>
    %493 = arith.subf %488, %492 : vector<8x8x128xf32>
    %c0_152 = arith.constant 0 : index
    %c0_153 = arith.constant 0 : index
    %c0_154 = arith.constant 0 : index
    %494 = vector.load %arg13[%c0_152, %c0_153, %c0_154] : memref<8x8x128xf32, #tpu.memory_space<vmem>>, vector<8x8x128xf32>
    tpu.vector_store %arg13[%c0_152, %c0_153, %c0_154], %493 {strides = array<i32>} : memref<8x8x128xf32, #tpu.memory_space<vmem>>, vector<8x8x128xf32>,
    return
  }
}

</mosaic_0001>

<bundles_post_ra>
// kernel: gru_embedding_forward.1
= control target key start
LH: loop header
LB: loop body
LE: loop exit
PB: predicated region body
PF: predicated region fallthrough
CT: control target
= control target key end

     0   :  { %v1886_v0 = vmov 0   ;;  %v55_v19 = vlaneseq  ;;  %v1887_v22 = vmov 1.0|1.0   ;;  %s1888_s16 = smov 64   ;;  %vm290_vm12 = vcmask 261120   ;;  %s1890_s22 = smov 96   ;;  %s2398_s0 = inlined_call_operand.vmem [shape: s32[64,1], index: 0, kind: input, shape index: {}]   ;;  %s2399_s2 = inlined_call_operand.vmem [shape: bf16[128,16], index: 2, kind: input, shape index: {}]   ;;  %s2400_s6 = inlined_call_operand.vmem [shape: f32[1,32], index: 6, kind: input, shape index: {}]   ;;  %s2401_s4 = inlined_call_operand.vmem [shape: bf16[32,128], index: 4, kind: input, shape index: {}]   ;;  %s2402_s1 = inlined_call_operand.vmem [shape: f32[2,8,32], index: 1, kind: input, shape index: {}]   ;;  %s2403_s5 = inlined_call_operand.vmem [shape: f32[1,128], index: 5, kind: input, shape index: {}]   ;;  %s2404_s3 = inlined_call_operand.vmem [shape: bf16[16,128], index: 3, kind: input, shape index: {}]   ;;  %s2405_s7 = inlined_call_operand.vmem [shape: bf16[32,128], index: 7, kind: input, shape index: {}]   ;;  %s2406_s9 = inlined_call_operand.vmem [shape: f32[1,128], index: 9, kind: input, shape index: {}]   ;;  %s2407_s10 = inlined_call_operand.vmem [shape: f32[1,32], index: 10, kind: input, shape index: {}]   ;;  %s2408_s8 = inlined_call_operand.vmem [shape: bf16[32,128], index: 8, kind: input, shape index: {}]   ;;  %s2409_s14 = inlined_call_operand.vmem [shape: f32[2,8,32], index: 14, kind: output, shape index: {1}]   ;;  %s2410_s11 = inlined_call_operand.vmem [shape: bf16[32,128], index: 11, kind: input, shape index: {}]   ;;  %s2411_s12 = inlined_call_operand.vmem [shape: f32[1,128], index: 12, kind: input, shape index: {}]   ;;  %s2412_s13 = inlined_call_operand.vmem [shape: f32[8,8,128], index: 13, kind: output, shape index: {0}]  }
   0x1   :  { %1764 = vset.pattern.permute.xlu1 %v1886_v0  ;;  %1763 = vset.pattern.permute.xlu0 %v1886_v0  ;;  %v49_v1 = vld [vmem:[%s2398_s0 + $0x10] sm:$0xff]  ;;  %v47_v2 = vld [vmem:[%s2398_s0] sm:$0xff]  ;;  %v1746_v4 = vld [vmem:[%s2399_s2 + $0x38] sm:$0xff]  ;;  %vm218_vm13 = vcmask 130048  }
   0x2   :  { %64 = vperm.xlu1 %1764, %v49_v1   ;;  %58 = vperm.xlu0 %1763, %v47_v2   ;;  %v51_v3 = vld [vmem:[%s2398_s0 + $0x20] sm:$0xff]  ;;  %v1745_v5 = vld [vmem:[%s2399_s2 + $0x30] sm:$0xff]  ;;  %v50_v6 = vld [vmem:[%s2398_s0 + $0x18] sm:$0xff]  ;;  %v56_v20 = vand.u32 127, %v55_v19 }
   0x3   :  { %1765 = vset.pattern.permute.xlu2 %v1886_v0  ;;  %173 = vmatpush.bf16.msra.mxu0 %v1746_v4  ;;  %v48_v7 = vld [vmem:[%s2398_s0 + $0x8] sm:$0xff]  ;;  %v1743_v10 = vld [vmem:[%s2399_s2 + $0x20] sm:$0xff]  ;;  %v54_v11 = vld [vmem:[%s2398_s0 + $0x38] sm:$0xff] }
   0x4   :  { %70 = vperm.xlu2 %1765, %v51_v3   ;;  %v52_v8 = vld [vmem:[%s2398_s0 + $0x28] sm:$0xff]  ;;  %v53_v12 = vld [vmem:[%s2398_s0 + $0x30] sm:$0xff]  ;;  %v1742_v13 = vld [vmem:[%s2399_s2 + $0x18] sm:$0xff] }
   0x5   :  { %v1744_v9 = vld [vmem:[%s2399_s2 + $0x28] sm:$0xff]  ;;  %v1741_v14 = vld [vmem:[%s2399_s2 + $0x10] sm:$0xff]  ;;  %v1739_v16 = vld [vmem:[%s2399_s2] sm:$0xff] }
   0x6   :  { %v1740_v15 = vld [vmem:[%s2399_s2 + $0x8] sm:$0xff]  ;;  %v2025_v23 = vld [vmem:[%s2401_s4] sm:$0xff] }
   0x7   :  { %174 = vmatpush.bf16.msra.mxu0 %v1745_v5  ;;  %v2017_v17 = vld [vmem:[%s2401_s4 + $0x8] sm:$0xff]  ;;  %v1766_v28 = vld [vmem:[%s2400_s6] ss:$0 sm:$0xff] }
   0x8   :  { %442 = vmatpush.bf16.msra.mxu2 %v2017_v17  ;;  %510 = vmatpush.bf16.msra.mxu3 %v2017_v17  ;;  %v275_v31 = vld [vmem:[%s2402_s1] sm:$0xff] }
   0x9   :  { %v277_v32 = vpack.c.bf16 %v275_v31, %v275_v31  ;;  %v1747_v33 = vld [vmem:[%s2404_s3] sm:$0xff]  ;;  %s1889_s3 = smov 32  }
   0xa   :  { %67 = vperm.xlu1 %1764, %v50_v6   ;;  %61 = vperm.xlu0 %1763, %v48_v7   ;;  %v1767_v50 = vld [vmem:[%s2403_s5] ss:$0 sm:$0xff] }
   0xb   :  { %175 = vmatpush.bf16.msra.mxu0 %v1744_v9  ;;  %238 = vmatpush.bf16.msra.mxu1 %v1747_v33 }
   0xc   :  { %73 = vperm.xlu2 %1765, %v52_v8   ;;  %443 = vmatpush.bf16.msra.mxu2 %v2025_v23 }
   0xd   :  { %511 = vmatpush.bf16.msra.mxu3 %v2025_v23 }
   0xf   :  { %176 = vmatpush.bf16.msra.mxu0 %v1743_v10  ;;  %374 = vmatpush.bf16.msrb.mxu1 %v2017_v17 }
  0x10   :  { %578 = vmatpush.bf16.msrb.mxu2 %v2017_v17 }
  0x11   :  { %646 = vmatpush.bf16.msrb.mxu3 %v2017_v17 }
  0x12   :  { %79 = vperm.xlu1 %1764, %v54_v11   ;;  %76 = vperm.xlu0 %1763, %v53_v12  }
  0x13   :  { %177 = vmatpush.bf16.msra.mxu0 %v1742_v13  ;;  %375 = vmatpush.bf16.msrb.mxu1 %v2025_v23 }
  0x14   :  { %579 = vmatpush.bf16.msrb.mxu2 %v2025_v23  ;;  %327 = vrot.lane.b32.xlu2 %v1766_v28, %s1888_s16 }
  0x15   :  { %647 = vmatpush.bf16.msrb.mxu3 %v2025_v23 }
  0x17   :  { %178 = vmatpush.bf16.msra.mxu0 %v1741_v14 }
  0x1b   :  { %179 = vmatpush.bf16.msra.mxu0 %v1740_v15 }
  0x1f   :  { %180 = vmatpush.bf16.msra.mxu0 %v1739_v16 }
  0x23   :  { %300 = vmatpush.bf16.msrb.mxu0 %v2017_v17 }
  0x27   :  { %301 = vmatpush.bf16.msrb.mxu0 %v2025_v23 }
  0x5e   :  { %v71_v26 = vpop.permute.xlu2 %70 }
  0x5f   :  { %vm85_vm6 = vcmp.eq.s32.totalorder %v56_v20, %v71_v26 }
  0x66   :  { %v74_v27 = vpop.permute.xlu2 %73 }
  0x67   :  { %vm86_vm7 = vcmp.eq.s32.totalorder %v56_v20, %v74_v27 }
  0x68   :  { %vm1653_vm8 = vmpackc.low %vm86_vm7, %vm85_vm6 }
  0x6e   :  { %v2047_v46 = vpop.permute.xlu2 %327 }
  0x74   :  { %v59_v18 = vpop.permute.xlu0 %58  ;;  %v65_v24 = vpop.permute.xlu1 %64 }
  0x75   :  { %vm81_vm1 = vcmp.eq.s32.totalorder %v56_v20, %v59_v18  ;;  %vm83_vm3 = vcmp.eq.s32.totalorder %v56_v20, %v65_v24 }
  0x7c   :  { %v62_v21 = vpop.permute.xlu0 %61  ;;  %v68_v25 = vpop.permute.xlu1 %67 }
  0x7d   :  { %vm82_vm0 = vcmp.eq.s32.totalorder %v56_v20, %v62_v21  ;;  %vm84_vm4 = vcmp.eq.s32.totalorder %v56_v20, %v68_v25 }
  0x7e   :  { %vm1649_vm2 = vmpackc.low %vm82_vm0, %vm81_vm1 }
  0x7f   :  { %1650 = vmatmul.msk.bf16.vlgmr.msra.gmra.mxu0 %vm1649_vm2, %v1887_v22  ;;  %vm1651_vm5 = vmpackc.low %vm84_vm4, %vm83_vm3 }
  0x84   :  { %v80_v29 = vpop.permute.xlu1 %79  ;;  %v77_v30 = vpop.permute.xlu0 %76 }
  0x85   :  { %vm88_vm9 = vcmp.eq.s32.totalorder %v56_v20, %v80_v29  ;;  %vm87_vm10 = vcmp.eq.s32.totalorder %v56_v20, %v77_v30 }
  0x86   :  { %vm1655_vm11 = vmpackc.low %vm88_vm9, %vm87_vm10 }
  0x8f   :  { %1652 = vmatmul.msk.bf16.gmra.mxu0 %vm1651_vm5, %v1887_v22 }
  0x9f   :  { %1654 = vmatmul.msk.bf16.gmra.mxu0 %vm1653_vm8, %v1887_v22 }
  0xaf   :  { %1656 = vmatmul.msk.bf16.gmra.mxu0 %vm1655_vm11, %v1887_v22 }
  0xbf   :  { %1673 = vmatmul.msk.bf16.vlgmr.msrb.gmra.mxu0 %vm290_vm12, %v277_v32 }
  0xfc   :  { %v182_v34 = vpop.f32.mrf.mxu0 }
 0x104   :  { %v184_v35 = vpop.f32.mrf.mxu0 }
 0x105   :  { %v202_v36 = vpack.c.bf16 %v184_v35, %v182_v34 }
 0x107   :  { %1661 = vmatmul.msk.bf16.vlgmr.msra.gmra.mxu1 %vm218_vm13, %v202_v36 }
 0x10c   :  { %v187_v37 = vpop.f32.mrf.mxu0 }
 0x114   :  { %v189_v38 = vpop.f32.mrf.mxu0 }
 0x115   :  { %v203_v39 = vpack.c.bf16 %v189_v38, %v187_v37 }
 0x117   :  { %1662 = vmatmul.msk.bf16.gmra.mxu1 %vm218_vm13, %v203_v39 }
 0x11c   :  { %v192_v40 = vpop.f32.mrf.mxu0 }
 0x124   :  { %v194_v41 = vpop.f32.mrf.mxu0 }
 0x125   :  { %v204_v42 = vpack.c.bf16 %v194_v41, %v192_v40 }
 0x127   :  { %1663 = vmatmul.msk.bf16.gmra.mxu1 %vm218_vm13, %v204_v42 }
 0x12c   :  { %v197_v43 = vpop.f32.mrf.mxu0 }
 0x134   :  { %v199_v44 = vpop.f32.mrf.mxu0 }
 0x135   :  { %v205_v45 = vpack.c.bf16 %v199_v44, %v197_v43 }
 0x137   :  { %1664 = vmatmul.msk.bf16.gmra.mxu1 %vm218_vm13, %v205_v45 }
 0x13c   :  { %v303_v47 = vpop.f32.mrf.mxu0 }
 0x13d   :  { %v330_v48 = vadd.f32 %v2047_v46, %v303_v47 }
 0x13f   :  { %332 = vrot.lane.b32.xlu0 %v330_v48, %s1888_s16 }
 0x144   :  { %v305_v49 = vpop.f32.mrf.mxu0 }
 0x147   :  { %349 = vrot.lane.b32.xlu0 %v275_v31, %s1889_s3 }
 0x184   :  { %v240_v51 = vpop.f32.mrf.mxu1 }
 0x185   :  { %v241_v52 = vadd.f32 %v1767_v50, %v240_v51 }
 0x187   :  { %v307_v53 = vadd.f32 %v303_v47, %v241_v52 }
 0x189   :  { %v1674_v54 = vmul.f32 -1.442695, %v307_v53 }
 0x18b   :  { %1771 = vpow2.f32 %v1674_v54 }
 0x18c   :  { %v242_v55 = vpop.f32.mrf.mxu1 }
 0x18d   :  { %v2055_v56 = vadd.f32 %v1767_v50, %v242_v55 }
 0x191   :  { %v1772_v57 = vpop.eup %1771 }
 0x192   :  { %v311_v58 = vadd.f32 1.0, %v1772_v57 }
 0x194   :  { %v245_v59 = vpop.f32.mrf.mxu1  ;;  %1773 = vrcp.f32 %v311_v58  ;;  %v323_v6 = vand.u32 2147483648, %v311_v58  ;;  %vm317_vm15 = vweird.f32 %v311_v58  ;;  %v321_v8 = vand.u32 2147483647, %v311_v58 }
 0x195   :  { %v2057_v60 = vadd.f32 %v1767_v50, %v245_v59 }
 0x196   :  { %v324_v11 = vor.u32 1.1754944e-38, %v323_v6  ;;  %vm322_vm1 = vcmp.eq.f32.partialorder %v321_v8, 8.507059e+37 }
 0x19a   :  { %v1774_v61 = vpop.eup %1773 }
 0x19b   :  { %v313_v0 = vmul.f32 %v1774_v61, %v311_v58  ;;  %vm318_vm14 = vweird.f32 %v1774_v61 }
 0x19c   :  { %v247_v62 = vpop.f32.mrf.mxu1  ;;  %vm319_vm0 = vmor %vm317_vm15, %vm318_vm14 }
 0x19d   :  { %v2059_v63 = vadd.f32 %v1767_v50, %v247_v62  ;;  %v314_v1 = vsub.f32 1.0, %v313_v0 }
 0x19f   :  { %v315_v4 = vmul.f32 %v1774_v61, %v314_v1 }
 0x1a1   :  { %v316_v5 = vadd.f32 %v1774_v61, %v315_v4 }
 0x1a3   :  { %v320_v10 = vsel %vm319_vm0, %v1774_v61, %v316_v5 }
 0x1a4   :  { %v250_v2 = vpop.f32.mrf.mxu1  ;;  %v325_v13 = vsel %vm322_vm1, %v324_v11, %v320_v10 }
 0x1a5   :  { %v2061_v3 = vadd.f32 %v1767_v50, %v250_v2  ;;  %v342_v22 = vsub.f32 1.0, %v325_v13 }
 0x1ac   :  { %v252_v7 = vpop.f32.mrf.mxu1 }
 0x1ad   :  { %v2063_v9 = vadd.f32 %v1767_v50, %v252_v7 }
 0x1b1   :  { %v333_v12 = vpop.permute.xlu0 %332 }
 0x1b2   :  { %v335_v14 = vmul.f32 %v333_v12, %v325_v13 }
 0x1b4   :  { %337 = vrot.lane.b32.xlu1 %v335_v14, %s1888_s16  ;;  %v255_v15 = vpop.f32.mrf.mxu1 }
 0x1b5   :  { %v2066_v16 = vadd.f32 %v1767_v50, %v255_v15 }
 0x1b9   :  { %v350_v21 = vpop.permute.xlu0 %349 }
 0x1ba   :  { %v352_v25 = vmul.f32 %v350_v21, %v325_v13 }
 0x1bc   :  { %v2075_v30 = vpop.f32.mrf.mxu1 }
 0x226   :  { %v338_v18 = vpop.permute.xlu1 %337 }
 0x227   :  { %v340_v19 = vadd.f32 %v338_v18, %v241_v52 }
 0x229   :  { %1775 = vtanh.f32 %v340_v19 }
 0x22f   :  { %v1776_v20 = vpop.eup %1775 }
 0x230   :  { %344 = vrot.lane.b32.xlu2 %v1776_v20, %s1890_s22 }
 0x28a   :  { %v345_v24 = vpop.permute.xlu2 %344 }
 0x28b   :  { %v347_v26 = vmul.f32 %v345_v24, %v342_v22 }
 0x28d   :  { %v2069_v27 = vadd.f32 %v352_v25, %v347_v26 }
 0x28f   :  { %v361_v28 = vpack.c.bf16 %v2069_v27, %v2069_v27 }
 0x291   :  { %363 = vrot.lane.b32.xlu1 %v361_v28, %s1890_s22 }
 0x303   :  { %v364_v29 = vpop.permute.xlu1 %363 }
 0x304   :  { %1675 = vmatmul.msk.bf16.vlgmr.msrb.gmra.mxu1 %vm290_vm12, %v364_v29 }
 0x381   :  { %v377_v31 = vpop.f32.mrf.mxu1 }
 0x382   :  { %v401_v32 = vadd.f32 %v377_v31, %v2047_v46  ;;  %v381_v34 = vadd.f32 %v377_v31, %v2055_v56 }
 0x384   :  { %403 = vrot.lane.b32.xlu2 %v401_v32, %s1888_s16  ;;  %v1676_v35 = vmul.f32 -1.442695, %v381_v34 }
 0x386   :  { %1777 = vpow2.f32 %v1676_v35 }
 0x389   :  { %v379_v33 = vpop.f32.mrf.mxu1 }
 0x38c   :  { %v1778_v36 = vpop.eup %1777 }
 0x38d   :  { %v385_v37 = vadd.f32 1.0, %v1778_v36 }
 0x38f   :  { %1779 = vrcp.f32 %v385_v37  ;;  %v397_v43 = vand.u32 2147483648, %v385_v37  ;;  %vm391_vm3 = vweird.f32 %v385_v37  ;;  %v395_v44 = vand.u32 2147483647, %v385_v37 }
 0x391   :  { %v398_v47 = vor.u32 1.1754944e-38, %v397_v43  ;;  %vm396_vm5 = vcmp.eq.f32.partialorder %v395_v44, 8.507059e+37 }
 0x395   :  { %v1780_v38 = vpop.eup %1779 }
 0x396   :  { %v387_v39 = vmul.f32 %v1780_v38, %v385_v37  ;;  %vm392_vm2 = vweird.f32 %v1780_v38 }
 0x397   :  { %vm393_vm4 = vmor %vm391_vm3, %vm392_vm2 }
 0x398   :  { %v388_v40 = vsub.f32 1.0, %v387_v39 }
 0x39a   :  { %v389_v41 = vmul.f32 %v1780_v38, %v388_v40 }
 0x39c   :  { %v390_v42 = vadd.f32 %v1780_v38, %v389_v41 }
 0x39e   :  { %v394_v45 = vsel %vm393_vm4, %v1780_v38, %v390_v42 }
 0x39f   :  { %v399_v49 = vsel %vm396_vm5, %v398_v47, %v394_v45 }
 0x3a0   :  { %v413_v54 = vsub.f32 1.0, %v399_v49  ;;  %v419_v57 = vmul.f32 %v399_v49, %v2069_v27 }
 0x3de   :  { %v404_v48 = vpop.permute.xlu2 %403 }
 0x3df   :  { %v406_v50 = vmul.f32 %v404_v48, %v399_v49 }
 0x3e1   :  { %408 = vrot.lane.b32.xlu0 %v406_v50, %s1888_s16 }
 0x453   :  { %v409_v51 = vpop.permute.xlu0 %408 }
 0x454   :  { %v411_v52 = vadd.f32 %v409_v51, %v2055_v56 }
 0x456   :  { %1781 = vtanh.f32 %v411_v52 }
 0x45c   :  { %v1782_v53 = vpop.eup %1781 }
 0x45d   :  { %415 = vrot.lane.b32.xlu1 %v1782_v53, %s1890_s22 }
 0x4cf   :  { %v416_v55 = vpop.permute.xlu1 %415 }
 0x4d0   :  { %v418_v58 = vmul.f32 %v416_v55, %v413_v54 }
 0x4d2   :  { %v2084_v59 = vadd.f32 %v419_v57, %v418_v58 }
 0x4d4   :  { %v429_v61 = vpack.c.bf16 %v2084_v59, %v2084_v59 }
 0x4d6   :  { %431 = vrot.lane.b32.xlu2 %v429_v61, %s1890_s22 }
 0x530   :  { %v432_v62 = vpop.permute.xlu2 %431 }
 0x531   :  { %1677 = vmatmul.msk.bf16.vlgmr.msra.gmra.mxu2 %vm290_vm12, %v432_v62 }
 0x532   :  { %714 = vmatpush.bf16.msra.mxu2 %v2017_v17 }
 0x536   :  { %715 = vmatpush.bf16.msra.mxu2 %v2025_v23 }
 0x5b4   :  { %v445_v56 = vpop.f32.mrf.mxu2 }
 0x5b5   :  { %v469_v0 = vadd.f32 %v445_v56, %v2047_v46  ;;  %v449_v2 = vadd.f32 %v445_v56, %v2057_v60 }
 0x5b7   :  { %471 = vrot.lane.b32.xlu0 %v469_v0, %s1888_s16  ;;  %v1678_v4 = vmul.f32 -1.442695, %v449_v2 }
 0x5b9   :  { %1783 = vpow2.f32 %v1678_v4 }
 0x5bc   :  { %v447_v1 = vpop.f32.mrf.mxu2 }
 0x5bf   :  { %v1784_v5 = vpop.eup %1783 }
 0x5c0   :  { %v453_v6 = vadd.f32 1.0, %v1784_v5 }
 0x5c2   :  { %1785 = vrcp.f32 %v453_v6  ;;  %v465_v13 = vand.u32 2147483648, %v453_v6  ;;  %vm459_vm7 = vweird.f32 %v453_v6  ;;  %v463_v14 = vand.u32 2147483647, %v453_v6 }
 0x5c4   :  { %v466_v18 = vor.u32 1.1754944e-38, %v465_v13  ;;  %vm464_vm9 = vcmp.eq.f32.partialorder %v463_v14, 8.507059e+37 }
 0x5c8   :  { %v1786_v7 = vpop.eup %1785 }
 0x5c9   :  { %v455_v8 = vmul.f32 %v1786_v7, %v453_v6  ;;  %vm460_vm6 = vweird.f32 %v1786_v7 }
 0x5ca   :  { %vm461_vm8 = vmor %vm459_vm7, %vm460_vm6 }
 0x5cb   :  { %v456_v10 = vsub.f32 1.0, %v455_v8 }
 0x5cd   :  { %v457_v11 = vmul.f32 %v1786_v7, %v456_v10 }
 0x5cf   :  { %v458_v12 = vadd.f32 %v1786_v7, %v457_v11 }
 0x5d1   :  { %v462_v15 = vsel %vm461_vm8, %v1786_v7, %v458_v12 }
 0x5d2   :  { %v467_v20 = vsel %vm464_vm9, %v466_v18, %v462_v15 }
 0x5d3   :  { %v481_v26 = vsub.f32 1.0, %v467_v20  ;;  %v487_v29 = vmul.f32 %v467_v20, %v2084_v59 }
 0x629   :  { %v472_v19 = vpop.permute.xlu0 %471 }
 0x62a   :  { %v474_v21 = vmul.f32 %v472_v19, %v467_v20 }
 0x62c   :  { %476 = vrot.lane.b32.xlu1 %v474_v21, %s1888_s16 }
 0x69e   :  { %v477_v22 = vpop.permute.xlu1 %476 }
 0x69f   :  { %v479_v24 = vadd.f32 %v477_v22, %v2057_v60 }
 0x6a1   :  { %1787 = vtanh.f32 %v479_v24 }
 0x6a7   :  { %v1788_v25 = vpop.eup %1787 }
 0x6a8   :  { %483 = vrot.lane.b32.xlu2 %v1788_v25, %s1890_s22 }
 0x702   :  { %v484_v28 = vpop.permute.xlu2 %483 }
 0x703   :  { %v486_v31 = vmul.f32 %v484_v28, %v481_v26 }
 0x705   :  { %v2099_v32 = vadd.f32 %v487_v29, %v486_v31 }
 0x707   :  { %v497_v33 = vpack.c.bf16 %v2099_v32, %v2099_v32 }
 0x709   :  { %499 = vrot.lane.b32.xlu0 %v497_v33, %s1890_s22 }
 0x77b   :  { %v500_v34 = vpop.permute.xlu0 %499 }
 0x77c   :  { %1679 = vmatmul.msk.bf16.vlgmr.msra.gmra.mxu3 %vm290_vm12, %v500_v34 }
 0x77d   :  { %782 = vmatpush.bf16.msra.mxu3 %v2017_v17 }
 0x781   :  { %783 = vmatpush.bf16.msra.mxu3 %v2025_v23 }
 0x7ff   :  { %v513_v60 = vpop.f32.mrf.mxu3 }
 0x800   :  { %v537_v35 = vadd.f32 %v513_v60, %v2047_v46  ;;  %v517_v37 = vadd.f32 %v513_v60, %v2059_v63 }
 0x802   :  { %539 = vrot.lane.b32.xlu1 %v537_v35, %s1888_s16  ;;  %v1680_v38 = vmul.f32 -1.442695, %v517_v37 }
 0x804   :  { %1789 = vpow2.f32 %v1680_v38 }
 0x807   :  { %v515_v36 = vpop.f32.mrf.mxu3 }
 0x80a   :  { %v1790_v39 = vpop.eup %1789 }
 0x80b   :  { %v521_v40 = vadd.f32 1.0, %v1790_v39 }
 0x80d   :  { %1791 = vrcp.f32 %v521_v40  ;;  %v533_v23 = vand.u32 2147483648, %v521_v40  ;;  %vm527_vm11 = vweird.f32 %v521_v40  ;;  %v531_v45 = vand.u32 2147483647, %v521_v40 }
 0x80f   :  { %v534_v48 = vor.u32 1.1754944e-38, %v533_v23  ;;  %vm532_vm14 = vcmp.eq.f32.partialorder %v531_v45, 8.507059e+37 }
 0x813   :  { %v1792_v41 = vpop.eup %1791 }
 0x814   :  { %v523_v42 = vmul.f32 %v1792_v41, %v521_v40  ;;  %vm528_vm10 = vweird.f32 %v1792_v41 }
 0x815   :  { %vm529_vm13 = vmor %vm527_vm11, %vm528_vm10 }
 0x816   :  { %v524_v43 = vsub.f32 1.0, %v523_v42 }
 0x818   :  { %v525_v44 = vmul.f32 %v1792_v41, %v524_v43 }
 0x81a   :  { %v526_v17 = vadd.f32 %v1792_v41, %v525_v44 }
 0x81c   :  { %v530_v47 = vsel %vm529_vm13, %v1792_v41, %v526_v17 }
 0x81d   :  { %v535_v50 = vsel %vm532_vm14, %v534_v48, %v530_v47 }
 0x81e   :  { %v549_v55 = vsub.f32 1.0, %v535_v50  ;;  %v555_v58 = vmul.f32 %v535_v50, %v2099_v32 }
 0x874   :  { %v540_v49 = vpop.permute.xlu1 %539 }
 0x875   :  { %v542_v51 = vmul.f32 %v540_v49, %v535_v50 }
 0x877   :  { %544 = vrot.lane.b32.xlu2 %v542_v51, %s1888_s16 }
 0x8d1   :  { %v545_v52 = vpop.permute.xlu2 %544 }
 0x8d2   :  { %v547_v53 = vadd.f32 %v545_v52, %v2059_v63 }
 0x8d4   :  { %1793 = vtanh.f32 %v547_v53 }
 0x8da   :  { %v1794_v54 = vpop.eup %1793 }
 0x8db   :  { %551 = vrot.lane.b32.xlu0 %v1794_v54, %s1890_s22 }
 0x94d   :  { %v552_v57 = vpop.permute.xlu0 %551 }
 0x94e   :  { %v554_v61 = vmul.f32 %v552_v57, %v549_v55 }
 0x950   :  { %v2114_v62 = vadd.f32 %v555_v58, %v554_v61  ;;  %v1751_v58 = vld [vmem:[%s2405_s7 + $0x8] sm:$0xff] }
 0x951   :  { %886 = vmatpush.bf16.msra.mxu1 %v1751_v58 }
 0x952   :  { %v565_v56 = vpack.c.bf16 %v2114_v62, %v2114_v62 }
 0x954   :  { %567 = vrot.lane.b32.xlu1 %v565_v56, %s1890_s22 }
 0x9c6   :  { %v568_v0 = vpop.permute.xlu1 %567 }
 0x9c7   :  { %1681 = vmatmul.msk.bf16.vlgmr.msrb.gmra.mxu2 %vm290_vm12, %v568_v0 }
 0xa4a   :  { %v581_v63 = vpop.f32.mrf.mxu2 }
 0xa4b   :  { %v605_v1 = vadd.f32 %v581_v63, %v2047_v46  ;;  %v585_v4 = vadd.f32 %v581_v63, %v2061_v3 }
 0xa4d   :  { %607 = vrot.lane.b32.xlu2 %v605_v1, %s1888_s16  ;;  %v1682_v5 = vmul.f32 -1.442695, %v585_v4 }
 0xa4f   :  { %1795 = vpow2.f32 %v1682_v5 }
 0xa52   :  { %v583_v2 = vpop.f32.mrf.mxu2 }
 0xa55   :  { %v1796_v6 = vpop.eup %1795 }
 0xa56   :  { %v589_v7 = vadd.f32 1.0, %v1796_v6  ;;  %v2161_v6 = vld [vmem:[%s2408_s8 + $0x8] sm:$0xff] }
 0xa57   :  { %949 = vmatpush.bf16.msrb.mxu2 %v2161_v6  ;;  %1220 = vmatpush.bf16.msra.mxu0 %v2161_v6 }
 0xa58   :  { %1797 = vrcp.f32 %v589_v7  ;;  %v601_v14 = vand.u32 2147483648, %v589_v7  ;;  %vm595_vm0 = vweird.f32 %v589_v7  ;;  %v599_v15 = vand.u32 2147483647, %v589_v7 }
 0xa5a   :  { %v602_v19 = vor.u32 1.1754944e-38, %v601_v14  ;;  %vm600_vm2 = vcmp.eq.f32.partialorder %v599_v15, 8.507059e+37 }
 0xa5e   :  { %v1798_v8 = vpop.eup %1797 }
 0xa5f   :  { %v591_v10 = vmul.f32 %v1798_v8, %v589_v7  ;;  %vm596_vm15 = vweird.f32 %v1798_v8  ;;  %v2167_v7 = vld [vmem:[%s2408_s8] sm:$0xff] }
 0xa60   :  { %vm597_vm1 = vmor %vm595_vm0, %vm596_vm15  ;;  %950 = vmatpush.bf16.msrb.mxu2 %v2167_v7  ;;  %1221 = vmatpush.bf16.msra.mxu0 %v2167_v7 }
 0xa61   :  { %v592_v11 = vsub.f32 1.0, %v591_v10  ;;  %v1769_v10 = vld [vmem:[%s2407_s10] ss:$0 sm:$0xff] }
 0xa63   :  { %v593_v12 = vmul.f32 %v1798_v8, %v592_v11  ;;  %v1701_v11 = vld [vmem:[%s2402_s1 + $0x8] sm:$0xff] }
 0xa64   :  { %1418 = vmatpush.bf16.msrb.mxu0 %v2161_v6 }
 0xa65   :  { %v594_v13 = vadd.f32 %v1798_v8, %v593_v12  ;;  %v927_v12 = vpack.c.bf16 %v1701_v11, %v1701_v11 }
 0xa67   :  { %v598_v18 = vsel %vm597_vm1, %v1798_v8, %v594_v13 }
 0xa68   :  { %v603_v21 = vsel %vm600_vm2, %v602_v19, %v598_v18  ;;  %1419 = vmatpush.bf16.msrb.mxu0 %v2167_v7 }
 0xa69   :  { %v617_v28 = vsub.f32 1.0, %v603_v21  ;;  %v623_v31 = vmul.f32 %v603_v21, %v2114_v62 }
 0xaa7   :  { %v608_v20 = vpop.permute.xlu2 %607 }
 0xaa8   :  { %v610_v22 = vmul.f32 %v608_v20, %v603_v21 }
 0xaaa   :  { %612 = vrot.lane.b32.xlu0 %v610_v22, %s1888_s16  ;;  %v2198_v22 = vld [vmem:[%s2406_s9] ss:$0 sm:$0xff] }
 0xb1c   :  { %v613_v24 = vpop.permute.xlu0 %612 }
 0xb1d   :  { %v615_v25 = vadd.f32 %v613_v24, %v2061_v3 }
 0xb1f   :  { %1799 = vtanh.f32 %v615_v25 }
 0xb25   :  { %v1800_v26 = vpop.eup %1799 }
 0xb26   :  { %619 = vrot.lane.b32.xlu1 %v1800_v26, %s1890_s22 }
 0xb98   :  { %v620_v29 = vpop.permute.xlu1 %619 }
 0xb99   :  { %v622_v33 = vmul.f32 %v620_v29, %v617_v28 }
 0xb9b   :  { %v2127_v34 = vadd.f32 %v623_v31, %v622_v33 }
 0xb9d   :  { %v633_v60 = vpack.c.bf16 %v2127_v34, %v2127_v34 }
 0xb9f   :  { %635 = vrot.lane.b32.xlu2 %v633_v60, %s1890_s22 }
 0xbf9   :  { %v636_v35 = vpop.permute.xlu2 %635 }
 0xbfa   :  { %1683 = vmatmul.msk.bf16.vlgmr.msrb.gmra.mxu3 %vm290_vm12, %v636_v35 }
 0xbfb   :  { %1022 = vmatpush.bf16.msrb.mxu3 %v2161_v6 }
 0xbff   :  { %1023 = vmatpush.bf16.msrb.mxu3 %v2167_v7 }
 0xc7d   :  { %v649_v3 = vpop.f32.mrf.mxu3 }
 0xc7e   :  { %v673_v36 = vadd.f32 %v649_v3, %v2047_v46  ;;  %v653_v38 = vadd.f32 %v649_v3, %v2063_v9 }
 0xc80   :  { %675 = vrot.lane.b32.xlu0 %v673_v36, %s1888_s16  ;;  %v1684_v39 = vmul.f32 -1.442695, %v653_v38 }
 0xc82   :  { %1801 = vpow2.f32 %v1684_v39 }
 0xc85   :  { %v651_v37 = vpop.f32.mrf.mxu3 }
 0xc88   :  { %v1802_v40 = vpop.eup %1801 }
 0xc89   :  { %v657_v41 = vadd.f32 1.0, %v1802_v40 }
 0xc8b   :  { %1803 = vrcp.f32 %v657_v41  ;;  %v669_v45 = vand.u32 2147483648, %v657_v41  ;;  %vm663_vm4 = vweird.f32 %v657_v41  ;;  %v667_v47 = vand.u32 2147483647, %v657_v41 }
 0xc8d   :  { %v670_v49 = vor.u32 1.1754944e-38, %v669_v45  ;;  %vm668_vm6 = vcmp.eq.f32.partialorder %v667_v47, 8.507059e+37 }
 0xc91   :  { %v1804_v42 = vpop.eup %1803 }
 0xc92   :  { %v659_v43 = vmul.f32 %v1804_v42, %v657_v41  ;;  %vm664_vm3 = vweird.f32 %v1804_v42 }
 0xc93   :  { %vm665_vm5 = vmor %vm663_vm4, %vm664_vm3 }
 0xc94   :  { %v660_v44 = vsub.f32 1.0, %v659_v43 }
 0xc96   :  { %v661_v17 = vmul.f32 %v1804_v42, %v660_v44 }
 0xc98   :  { %v662_v23 = vadd.f32 %v1804_v42, %v661_v17 }
 0xc9a   :  { %v666_v48 = vsel %vm665_vm5, %v1804_v42, %v662_v23 }
 0xc9b   :  { %v671_v51 = vsel %vm668_vm6, %v670_v49, %v666_v48 }
 0xc9c   :  { %v691_v56 = vmul.f32 %v671_v51, %v2127_v34 }
 0xcf2   :  { %v676_v50 = vpop.permute.xlu0 %675 }
 0xcf3   :  { %v678_v52 = vmul.f32 %v676_v50, %v671_v51 }
 0xcf5   :  { %680 = vrot.lane.b32.xlu1 %v678_v52, %s1888_s16 }
 0xcfd   :  { %355 = vrot.lane.b32.xlu1 %v2069_v27, %s1890_s22  ;;  %v1750_v27 = vld [vmem:[%s2405_s7] sm:$0xff] }
 0xcfe   :  { %887 = vmatpush.bf16.msra.mxu1 %v1750_v27 }
 0xd67   :  { %v681_v53 = vpop.permute.xlu1 %680 }
 0xd68   :  { %v683_v54 = vadd.f32 %v681_v53, %v2063_v9  ;;  %v685_v9 = vsub.f32 1.0, %v671_v51 }
 0xd6a   :  { %1805 = vtanh.f32 %v683_v54 }
 0xd6f   :  { %v356_v55 = vpop.permute.xlu1 %355 }
 0xd70   :  { %v1806_v57 = vpop.eup %1805  ;;  %358 = vst.msk [vmem:[#allocation3] sm:$0xff] %vm290_vm12, %v356_v55 }
 0xd71   :  { %687 = vrot.lane.b32.xlu2 %v1806_v57, %s1890_s22 }
 0xd77   :  { %v836_v2 = vld [vmem:[#allocation3] sm:$0xff] }
 0xd79   :  { %422 = vrot.lane.b32.xlu2 %v2084_v59, %s1890_s22 }
 0xdcb   :  { %v688_v61 = vpop.permute.xlu2 %687 }
 0xdcc   :  { %v690_v0 = vmul.f32 %v688_v61, %v685_v9 }
 0xdce   :  { %v2151_v63 = vadd.f32 %v691_v56, %v690_v0 }
 0xdd0   :  { %v701_v59 = vpack.c.bf16 %v2151_v63, %v2151_v63 }
 0xdd2   :  { %703 = vrot.lane.b32.xlu0 %v701_v59, %s1890_s22 }
 0xdd3   :  { %v423_v1 = vpop.permute.xlu2 %422 }
 0xdd4   :  { %426 = vst.msk [vmem:[#allocation3 + $0x8] sm:$0xff] %vm290_vm12, %v423_v1 }
 0xdda   :  { %976 = vrot.lane.b32.xlu0 %v1769_v10, %s1888_s16 }
 0xddb   :  { %v837_v4 = vld [vmem:[#allocation3 + $0x8] sm:$0xff] }
 0xddc   :  { %v844_v5 = vpack.c.bf16 %v837_v4, %v836_v2 }
 0xdde   :  { %1697 = vmatmul.msk.bf16.vlgmr.msra.gmra.mxu1 %vm290_vm12, %v844_v5 }
 0xe44   :  { %v704_v8 = vpop.permute.xlu0 %703 }
 0xe45   :  { %1685 = vmatmul.msk.bf16.vlgmr.msra.gmra.mxu2 %vm290_vm12, %v704_v8 }
 0xe46   :  { %1088 = vmatpush.bf16.msra.mxu2 %v2161_v6 }
 0xe4a   :  { %1089 = vmatpush.bf16.msra.mxu2 %v2167_v7 }
 0xe4c   :  { %v2191_v18 = vpop.permute.xlu0 %976 }
 0xe55   :  { %1710 = vmatmul.msk.bf16.vlgmr.msrb.gmra.mxu2 %vm290_vm12, %v927_v12 }
 0xe56   :  { %1286 = vmatpush.bf16.msrb.mxu2 %v2161_v6 }
 0xe5a   :  { %1287 = vmatpush.bf16.msrb.mxu2 %v2167_v7 }
 0xe5b   :  { %v889_v24 = vpop.f32.mrf.mxu1 }
 0xe5c   :  { %v890_v25 = vadd.f32 %v2198_v22, %v889_v24 }
 0xec8   :  { %v717_v13 = vpop.f32.mrf.mxu2 }
 0xec9   :  { %v741_v14 = vadd.f32 %v717_v13, %v2047_v46  ;;  %v721_v29 = vadd.f32 %v717_v13, %v2066_v16 }
 0xecb   :  { %743 = vrot.lane.b32.xlu1 %v741_v14, %s1888_s16  ;;  %v1686_v31 = vmul.f32 -1.442695, %v721_v29 }
 0xed0   :  { %v719_v15 = vpop.f32.mrf.mxu2 }
 0xed8   :  { %v952_v19 = vpop.f32.mrf.mxu2 }
 0xed9   :  { %v979_v20 = vadd.f32 %v2191_v18, %v952_v19  ;;  %v956_v26 = vadd.f32 %v952_v19, %v890_v25 }
 0xedb   :  { %981 = vrot.lane.b32.xlu2 %v979_v20, %s1888_s16  ;;  %v1711_v28 = vmul.f32 -1.442695, %v956_v26 }
 0xedd   :  { %1807 = vpow2.f32 %v1711_v28 }
 0xede   :  { %1809 = vpow2.f32 %v1686_v31 }
 0xee0   :  { %v954_v21 = vpop.f32.mrf.mxu2 }
 0xee3   :  { %v1808_v33 = vpop.eup %1807 }
 0xee4   :  { %v960_v60 = vadd.f32 1.0, %v1808_v33  ;;  %v1810_v35 = vpop.eup %1809  ;;  %v891_v33 = vpop.f32.mrf.mxu1 }
 0xee5   :  { %v725_v3 = vadd.f32 1.0, %v1810_v35 }
 0xee6   :  { %1811 = vrcp.f32 %v960_v60  ;;  %v972_v44 = vand.u32 2147483648, %v960_v60  ;;  %vm966_vm8 = vweird.f32 %v960_v60  ;;  %v970_v17 = vand.u32 2147483647, %v960_v60 }
 0xee7   :  { %1813 = vrcp.f32 %v725_v3  ;;  %v737_v52 = vand.u32 2147483648, %v725_v3  ;;  %vm731_vm13 = vweird.f32 %v725_v3  ;;  %v735_v53 = vand.u32 2147483647, %v725_v3 }
 0xee8   :  { %v973_v47 = vor.u32 1.1754944e-38, %v972_v44  ;;  %vm971_vm10 = vcmp.eq.f32.partialorder %v970_v17, 8.507059e+37 }
 0xee9   :  { %v738_v55 = vor.u32 1.1754944e-38, %v737_v52  ;;  %vm736_vm15 = vcmp.eq.f32.partialorder %v735_v53, 8.507059e+37 }
 0xeec   :  { %v1812_v36 = vpop.eup %1811 }
 0xeed   :  { %v962_v37 = vmul.f32 %v1812_v36, %v960_v60  ;;  %v1814_v39 = vpop.eup %1813  ;;  %vm967_vm7 = vweird.f32 %v1812_v36  ;;  %v892_v60 = vadd.f32 %v2198_v22, %v891_v33 }
 0xeee   :  { %v727_v41 = vmul.f32 %v1814_v39, %v725_v3  ;;  %vm968_vm9 = vmor %vm966_vm8, %vm967_vm7  ;;  %vm732_vm11 = vweird.f32 %v1814_v39 }
 0xeef   :  { %v963_v38 = vsub.f32 1.0, %v962_v37  ;;  %vm733_vm14 = vmor %vm731_vm13, %vm732_vm11 }
 0xef0   :  { %v728_v43 = vsub.f32 1.0, %v727_v41 }
 0xef1   :  { %v964_v40 = vmul.f32 %v1812_v36, %v963_v38 }
 0xef2   :  { %v729_v45 = vmul.f32 %v1814_v39, %v728_v43 }
 0xef3   :  { %v965_v42 = vadd.f32 %v1812_v36, %v964_v40 }
 0xef4   :  { %v730_v51 = vadd.f32 %v1814_v39, %v729_v45 }
 0xef5   :  { %v969_v23 = vsel %vm968_vm9, %v1812_v36, %v965_v42 }
 0xef6   :  { %v974_v49 = vsel %vm971_vm10, %v973_v47, %v969_v23  ;;  %v734_v54 = vsel %vm733_vm14, %v1814_v39, %v730_v51 }
 0xef7   :  { %v739_v58 = vsel %vm736_vm15, %v738_v55, %v734_v54 }
 0xef8   :  { %v753_v2 = vsub.f32 1.0, %v739_v58  ;;  %v759_v5 = vmul.f32 %v739_v58, %v2151_v63 }
 0xf35   :  { %v982_v48 = vpop.permute.xlu2 %981 }
 0xf36   :  { %v984_v50 = vmul.f32 %v982_v48, %v974_v49 }
 0xf38   :  { %986 = vrot.lane.b32.xlu1 %v984_v50, %s1888_s16 }
 0xf3d   :  { %v744_v57 = vpop.permute.xlu1 %743 }
 0xf3e   :  { %v746_v27 = vmul.f32 %v744_v57, %v739_v58 }
 0xf40   :  { %998 = vrot.lane.b32.xlu1 %v1701_v11, %s1889_s3  ;;  %748 = vrot.lane.b32.xlu0 %v746_v27, %s1888_s16 }
 0xfaa   :  { %v987_v9 = vpop.permute.xlu1 %986 }
 0xfab   :  { %v989_v61 = vadd.f32 %v987_v9, %v890_v25 }
 0xfad   :  { %1815 = vtanh.f32 %v989_v61 }
 0xfb2   :  { %v749_v56 = vpop.permute.xlu0 %748  ;;  %v999_v12 = vpop.permute.xlu1 %998 }
 0xfb3   :  { %v1816_v0 = vpop.eup %1815  ;;  %v751_v59 = vadd.f32 %v749_v56, %v2066_v16  ;;  %v991_v16 = vsub.f32 1.0, %v974_v49  ;;  %v1001_v14 = vmul.f32 %v999_v12, %v974_v49 }
 0xfb4   :  { %993 = vrot.lane.b32.xlu0 %v1816_v0, %s1890_s22 }
 0xfb5   :  { %1817 = vtanh.f32 %v751_v59 }
 0xfbb   :  { %v1818_v1 = vpop.eup %1817 }
 0xfbc   :  { %755 = vrot.lane.b32.xlu2 %v1818_v1, %s1890_s22 }
0x1016   :  { %v756_v4 = vpop.permute.xlu2 %755 }
0x1017   :  { %v758_v8 = vmul.f32 %v756_v4, %v753_v2 }
0x1019   :  { %v2209_v10 = vadd.f32 %v759_v5, %v758_v8 }
0x101b   :  { %v769_v11 = vpack.c.bf16 %v2209_v10, %v2209_v10 }
0x101d   :  { %771 = vrot.lane.b32.xlu2 %v769_v11, %s1890_s22 }
0x1026   :  { %v994_v13 = vpop.permute.xlu0 %993 }
0x1027   :  { %v996_v15 = vmul.f32 %v994_v13, %v991_v16 }
0x1029   :  { %v2214_v19 = vadd.f32 %v1001_v14, %v996_v15 }
0x102b   :  { %v1009_v20 = vpack.c.bf16 %v2214_v19, %v2214_v19 }
0x102d   :  { %1011 = vrot.lane.b32.xlu0 %v1009_v20, %s1890_s22 }
0x1077   :  { %v772_v21 = vpop.permute.xlu2 %771 }
0x1078   :  { %1687 = vmatmul.msk.bf16.vlgmr.msra.gmra.mxu3 %vm290_vm12, %v772_v21 }
0x1079   :  { %1154 = vmatpush.bf16.msra.mxu3 %v2161_v6 }
0x107d   :  { %1155 = vmatpush.bf16.msra.mxu3 %v2167_v7 }
0x109f   :  { %v1012_v24 = vpop.permute.xlu0 %1011 }
0x10a0   :  { %1712 = vmatmul.msk.bf16.vlgmr.msrb.gmra.mxu3 %vm290_vm12, %v1012_v24 }
0x10a1   :  { %1352 = vmatpush.bf16.msrb.mxu3 %v2161_v6 }
0x10a5   :  { %1353 = vmatpush.bf16.msrb.mxu3 %v2167_v7 }
0x10fb   :  { %v2225_v25 = vpop.f32.mrf.mxu3 }
0x1103   :  { %v787_v26 = vpop.f32.mrf.mxu3 }
0x1123   :  { %v1025_v28 = vpop.f32.mrf.mxu3 }
0x1124   :  { %v1049_v29 = vadd.f32 %v1025_v28, %v2191_v18  ;;  %v1029_v35 = vadd.f32 %v1025_v28, %v892_v60 }
0x1126   :  { %1051 = vrot.lane.b32.xlu1 %v1049_v29, %s1888_s16  ;;  %v1713_v3 = vmul.f32 -1.442695, %v1029_v35 }
0x1128   :  { %1819 = vpow2.f32 %v1713_v3 }
0x112b   :  { %v1027_v31 = vpop.f32.mrf.mxu3 }
0x112e   :  { %v1820_v36 = vpop.eup %1819 }
0x112f   :  { %v1033_v37 = vadd.f32 1.0, %v1820_v36 }
0x1131   :  { %1821 = vrcp.f32 %v1033_v37  ;;  %v1045_v41 = vand.u32 2147483648, %v1033_v37  ;;  %vm1039_vm1 = vweird.f32 %v1033_v37  ;;  %v1043_v42 = vand.u32 2147483647, %v1033_v37 }
0x1133   :  { %v1046_v44 = vor.u32 1.1754944e-38, %v1045_v41  ;;  %vm1044_vm3 = vcmp.eq.f32.partialorder %v1043_v42, 8.507059e+37 }
0x1137   :  { %v1822_v6 = vpop.eup %1821 }
0x1138   :  { %v1035_v7 = vmul.f32 %v1822_v6, %v1033_v37  ;;  %vm1040_vm0 = vweird.f32 %v1822_v6 }
0x1139   :  { %vm1041_vm2 = vmor %vm1039_vm1, %vm1040_vm0 }
0x113a   :  { %v1036_v38 = vsub.f32 1.0, %v1035_v7 }
0x113c   :  { %v1037_v39 = vmul.f32 %v1822_v6, %v1036_v38 }
0x113e   :  { %v1038_v40 = vadd.f32 %v1822_v6, %v1037_v39 }
0x1140   :  { %v1042_v43 = vsel %vm1041_vm2, %v1822_v6, %v1038_v40 }
0x1141   :  { %v1047_v23 = vsel %vm1044_vm3, %v1046_v44, %v1042_v43 }
0x1142   :  { %v1061_v51 = vsub.f32 1.0, %v1047_v23  ;;  %v1067_v53 = vmul.f32 %v1047_v23, %v2214_v19 }
0x1198   :  { %v1052_v17 = vpop.permute.xlu1 %1051 }
0x1199   :  { %v1054_v45 = vmul.f32 %v1052_v17, %v1047_v23 }
0x119b   :  { %1056 = vrot.lane.b32.xlu2 %v1054_v45, %s1888_s16 }
0x11a3   :  { %490 = vrot.lane.b32.xlu2 %v2099_v32, %s1890_s22 }
0x11f5   :  { %v1057_v47 = vpop.permute.xlu2 %1056 }
0x11f6   :  { %v1059_v48 = vadd.f32 %v1057_v47, %v892_v60 }
0x11f8   :  { %1823 = vtanh.f32 %v1059_v48 }
0x11fd   :  { %v491_v49 = vpop.permute.xlu2 %490 }
0x11fe   :  { %v1824_v50 = vpop.eup %1823  ;;  %494 = vst.msk [vmem:[#allocation3 + $0x10] sm:$0xff] %vm290_vm12, %v491_v49 }
0x11ff   :  { %1063 = vrot.lane.b32.xlu0 %v1824_v50, %s1890_s22 }
0x1205   :  { %v838_v58 = vld [vmem:[#allocation3 + $0x10] sm:$0xff] }
0x1207   :  { %558 = vrot.lane.b32.xlu0 %v2114_v62, %s1890_s22 }
0x1271   :  { %v1064_v52 = vpop.permute.xlu0 %1063 }
0x1272   :  { %v1066_v54 = vmul.f32 %v1064_v52, %v1061_v51 }
0x1274   :  { %v2238_v55 = vadd.f32 %v1067_v53, %v1066_v54 }
0x1276   :  { %v1075_v32 = vpack.c.bf16 %v2238_v55, %v2238_v55 }
0x1278   :  { %1077 = vrot.lane.b32.xlu1 %v1075_v32, %s1890_s22 }
0x1279   :  { %v559_v57 = vpop.permute.xlu0 %558 }
0x127a   :  { %562 = vst.msk [vmem:[#allocation3 + $0x18] sm:$0xff] %vm290_vm12, %v559_v57 }
0x1281   :  { %v839_v27 = vld [vmem:[#allocation3 + $0x18] sm:$0xff] }
0x1282   :  { %v845_v9 = vpack.c.bf16 %v839_v27, %v838_v58 }
0x1284   :  { %1698 = vmatmul.msk.bf16.gmra.mxu1 %vm290_vm12, %v845_v9 }
0x12ea   :  { %v1078_v62 = vpop.permute.xlu1 %1077 }
0x12eb   :  { %1714 = vmatmul.msk.bf16.vlgmr.msra.gmra.mxu2 %vm290_vm12, %v1078_v62 }
0x1301   :  { %v894_v59 = vpop.f32.mrf.mxu1 }
0x1302   :  { %v895_v1 = vadd.f32 %v2198_v22, %v894_v59 }
0x1309   :  { %v896_v42 = vpop.f32.mrf.mxu1 }
0x130a   :  { %v897_v43 = vadd.f32 %v2198_v22, %v896_v42 }
0x136e   :  { %v1091_v61 = vpop.f32.mrf.mxu2 }
0x136f   :  { %v1115_v56 = vadd.f32 %v1091_v61, %v2191_v18  ;;  %v1095_v2 = vadd.f32 %v1091_v61, %v895_v1 }
0x1371   :  { %1117 = vrot.lane.b32.xlu1 %v1115_v56, %s1888_s16  ;;  %v1715_v4 = vmul.f32 -1.442695, %v1095_v2 }
0x1373   :  { %1825 = vpow2.f32 %v1715_v4 }
0x1376   :  { %v1093_v0 = vpop.f32.mrf.mxu2 }
0x1379   :  { %v1826_v5 = vpop.eup %1825 }
0x137a   :  { %v1099_v8 = vadd.f32 1.0, %v1826_v5 }
0x137c   :  { %1827 = vrcp.f32 %v1099_v8  ;;  %v1111_v15 = vand.u32 2147483648, %v1099_v8  ;;  %vm1105_vm5 = vweird.f32 %v1099_v8  ;;  %v1109_v20 = vand.u32 2147483647, %v1099_v8 }
0x137e   :  { %v1112_v24 = vor.u32 1.1754944e-38, %v1111_v15  ;;  %vm1110_vm7 = vcmp.eq.f32.partialorder %v1109_v20, 8.507059e+37 }
0x1382   :  { %v1828_v11 = vpop.eup %1827 }
0x1383   :  { %v1101_v12 = vmul.f32 %v1828_v11, %v1099_v8  ;;  %vm1106_vm4 = vweird.f32 %v1828_v11 }
0x1384   :  { %vm1107_vm6 = vmor %vm1105_vm5, %vm1106_vm4 }
0x1385   :  { %v1102_v16 = vsub.f32 1.0, %v1101_v12 }
0x1387   :  { %v1103_v13 = vmul.f32 %v1828_v11, %v1102_v16 }
0x1389   :  { %v1104_v14 = vadd.f32 %v1828_v11, %v1103_v13 }
0x138b   :  { %v1108_v21 = vsel %vm1107_vm6, %v1828_v11, %v1104_v14 }
0x138c   :  { %v1113_v28 = vsel %vm1110_vm7, %v1112_v24, %v1108_v21 }
0x138d   :  { %v1127_v35 = vsub.f32 1.0, %v1113_v28  ;;  %v1133_v36 = vmul.f32 %v1113_v28, %v2238_v55 }
0x13e3   :  { %v1118_v26 = vpop.permute.xlu1 %1117 }
0x13e4   :  { %v1120_v29 = vmul.f32 %v1118_v26, %v1113_v28 }
0x13e6   :  { %1122 = vrot.lane.b32.xlu2 %v1120_v29, %s1888_s16 }
0x1440   :  { %v1123_v31 = vpop.permute.xlu2 %1122 }
0x1441   :  { %v1125_v33 = vadd.f32 %v1123_v31, %v895_v1 }
0x1443   :  { %1829 = vtanh.f32 %v1125_v33 }
0x1449   :  { %v1830_v60 = vpop.eup %1829 }
0x144a   :  { %1129 = vrot.lane.b32.xlu0 %v1830_v60, %s1890_s22 }
0x14bc   :  { %v1130_v3 = vpop.permute.xlu0 %1129 }
0x14bd   :  { %v1132_v37 = vmul.f32 %v1130_v3, %v1127_v35 }
0x14bf   :  { %v2252_v6 = vadd.f32 %v1133_v36, %v1132_v37 }
0x14c1   :  { %v1141_v7 = vpack.c.bf16 %v2252_v6, %v2252_v6 }
0x14c3   :  { %1143 = vrot.lane.b32.xlu1 %v1141_v7, %s1890_s22 }
0x1535   :  { %v1144_v38 = vpop.permute.xlu1 %1143 }
0x1536   :  { %1716 = vmatmul.msk.bf16.vlgmr.msra.gmra.mxu3 %vm290_vm12, %v1144_v38 }
0x15b9   :  { %v1157_v39 = vpop.f32.mrf.mxu3 }
0x15ba   :  { %v1181_v40 = vadd.f32 %v1157_v39, %v2191_v18  ;;  %v1161_v44 = vadd.f32 %v1157_v39, %v897_v43 }
0x15bc   :  { %1183 = vrot.lane.b32.xlu2 %v1181_v40, %s1888_s16  ;;  %v1717_v17 = vmul.f32 -1.442695, %v1161_v44  ;;  %v809_v44 = vadd.f32 %v2225_v25, %v2047_v46  ;;  %v1885_v46 = vld [vmem:[%s2403_s5] ss:$0 sm:$0xff] }
0x15be   :  { %1831 = vpow2.f32 %v1717_v17 }
0x15c1   :  { %v1159_v41 = vpop.f32.mrf.mxu3 }
0x15c4   :  { %626 = vrot.lane.b32.xlu2 %v2127_v34, %s1890_s22  ;;  %v1832_v23 = vpop.eup %1831 }
0x15c5   :  { %v1165_v45 = vadd.f32 1.0, %v1832_v23 }
0x15c7   :  { %1833 = vrcp.f32 %v1165_v45  ;;  %v1177_v52 = vand.u32 2147483648, %v1165_v45  ;;  %vm1171_vm9 = vweird.f32 %v1165_v45  ;;  %v1175_v53 = vand.u32 2147483647, %v1165_v45 }
0x15c9   :  { %v1178_v54 = vor.u32 1.1754944e-38, %v1177_v52  ;;  %vm1176_vm11 = vcmp.eq.f32.partialorder %v1175_v53, 8.507059e+37 }
0x15cd   :  { %v1834_v47 = vpop.eup %1833 }
0x15ce   :  { %v1167_v48 = vmul.f32 %v1834_v47, %v1165_v45  ;;  %vm1172_vm8 = vweird.f32 %v1834_v47 }
0x15cf   :  { %vm1173_vm10 = vmor %vm1171_vm9, %vm1172_vm8 }
0x15d0   :  { %v1168_v49 = vsub.f32 1.0, %v1167_v48 }
0x15d2   :  { %v1169_v50 = vmul.f32 %v1834_v47, %v1168_v49 }
0x15d4   :  { %v1170_v51 = vadd.f32 %v1834_v47, %v1169_v50 }
0x15d6   :  { %v1174_v34 = vsel %vm1173_vm10, %v1834_v47, %v1170_v51  ;;  %v258_v51 = vadd.f32 %v1885_v46, %v2075_v30 }
0x15d7   :  { %v1179_v57 = vsel %vm1176_vm11, %v1178_v54, %v1174_v34 }
0x15d8   :  { %v1193_v2 = vsub.f32 1.0, %v1179_v57  ;;  %v1199_v5 = vmul.f32 %v1179_v57, %v2252_v6  ;;  %v789_v52 = vadd.f32 %v2225_v25, %v258_v51 }
0x15da   :  { %v1688_v53 = vmul.f32 -1.442695, %v789_v52 }
0x1616   :  { %v1184_v32 = vpop.permute.xlu2 %1183 }
0x1617   :  { %v1186_v58 = vmul.f32 %v1184_v32, %v1179_v57 }
0x1619   :  { %1188 = vrot.lane.b32.xlu0 %v1186_v58, %s1888_s16 }
0x161e   :  { %v627_v27 = vpop.permute.xlu2 %626 }
0x161f   :  { %630 = vst.msk [vmem:[#allocation3 + $0x20] sm:$0xff] %vm290_vm12, %v627_v27 }
0x1621   :  { %694 = vrot.lane.b32.xlu0 %v2151_v63, %s1890_s22 }
0x1626   :  { %v840_v0 = vld [vmem:[#allocation3 + $0x20] sm:$0xff] }
0x168b   :  { %v1189_v9 = vpop.permute.xlu0 %1188 }
0x168c   :  { %v1191_v62 = vadd.f32 %v1189_v9, %v897_v43 }
0x168e   :  { %1835 = vtanh.f32 %v1191_v62 }
0x1693   :  { %v695_v61 = vpop.permute.xlu0 %694 }
0x1694   :  { %v1836_v56 = vpop.eup %1835  ;;  %698 = vst.msk [vmem:[#allocation3 + $0x28] sm:$0xff] %vm290_vm12, %v695_v61 }
0x1695   :  { %1195 = vrot.lane.b32.xlu1 %v1836_v56, %s1890_s22 }
0x169b   :  { %v841_v59 = vld [vmem:[#allocation3 + $0x28] sm:$0xff] }
0x169c   :  { %v846_v1 = vpack.c.bf16 %v841_v59, %v840_v0 }
0x169e   :  { %1699 = vmatmul.msk.bf16.gmra.mxu1 %vm290_vm12, %v846_v1 }
0x1707   :  { %v1196_v4 = vpop.permute.xlu1 %1195 }
0x1708   :  { %v1198_v8 = vmul.f32 %v1196_v4, %v1193_v2 }
0x170a   :  { %v2271_v63 = vadd.f32 %v1199_v5, %v1198_v8 }
0x170c   :  { %v1207_v11 = vpack.c.bf16 %v2271_v63, %v2271_v63 }
0x170e   :  { %1209 = vrot.lane.b32.xlu1 %v1207_v11, %s1890_s22 }
0x171b   :  { %v899_v15 = vpop.f32.mrf.mxu1 }
0x171c   :  { %v900_v20 = vadd.f32 %v2198_v22, %v899_v15 }
0x1723   :  { %v901_v5 = vpop.f32.mrf.mxu1 }
0x1724   :  { %v902_v8 = vadd.f32 %v2198_v22, %v901_v5 }
0x1780   :  { %v1210_v12 = vpop.permute.xlu1 %1209 }
0x1781   :  { %1718 = vmatmul.msk.bf16.vlgmr.msra.gmra.mxu0 %vm290_vm12, %v1210_v12 }
0x17fe   :  { %v1223_v16 = vpop.f32.mrf.mxu0 }
0x17ff   :  { %v1247_v13 = vadd.f32 %v1223_v16, %v2191_v18  ;;  %v1227_v21 = vadd.f32 %v1223_v16, %v900_v20 }
0x1801   :  { %1249 = vrot.lane.b32.xlu2 %v1247_v13, %s1888_s16  ;;  %v1719_v24 = vmul.f32 -1.442695, %v1227_v21 }
0x1803   :  { %1837 = vpow2.f32 %v1719_v24 }
0x1806   :  { %v1225_v14 = vpop.f32.mrf.mxu0 }
0x1809   :  { %v1838_v26 = vpop.eup %1837 }
0x180a   :  { %v1231_v28 = vadd.f32 1.0, %v1838_v26 }
0x180c   :  { %1839 = vrcp.f32 %v1231_v28  ;;  %v1243_v3 = vand.u32 2147483648, %v1231_v28  ;;  %vm1237_vm14 = vweird.f32 %v1231_v28  ;;  %v1241_v36 = vand.u32 2147483647, %v1231_v28 }
0x180e   :  { %v1244_v7 = vor.u32 1.1754944e-38, %v1243_v3  ;;  %vm1242_vm0 = vcmp.eq.f32.partialorder %v1241_v36, 8.507059e+37 }
0x1812   :  { %v1840_v29 = vpop.eup %1839 }
0x1813   :  { %v1233_v31 = vmul.f32 %v1840_v29, %v1231_v28  ;;  %vm1238_vm13 = vweird.f32 %v1840_v29 }
0x1814   :  { %vm1239_vm15 = vmor %vm1237_vm14, %vm1238_vm13 }
0x1815   :  { %v1234_v33 = vsub.f32 1.0, %v1233_v31 }
0x1817   :  { %v1235_v60 = vmul.f32 %v1840_v29, %v1234_v33 }
0x1819   :  { %v1236_v35 = vadd.f32 %v1840_v29, %v1235_v60 }
0x181b   :  { %v1240_v37 = vsel %vm1239_vm15, %v1840_v29, %v1236_v35 }
0x181c   :  { %v1245_v39 = vsel %vm1242_vm0, %v1244_v7, %v1240_v37 }
0x181d   :  { %v1259_v17 = vsub.f32 1.0, %v1245_v39  ;;  %v1265_v45 = vmul.f32 %v1245_v39, %v2271_v63 }
0x185b   :  { %v1250_v38 = vpop.permute.xlu2 %1249 }
0x185c   :  { %v1252_v40 = vmul.f32 %v1250_v38, %v1245_v39 }
0x185e   :  { %1254 = vrot.lane.b32.xlu0 %v1252_v40, %s1888_s16 }
0x18d0   :  { %v1255_v41 = vpop.permute.xlu0 %1254 }
0x18d1   :  { %v1257_v42 = vadd.f32 %v1255_v41, %v900_v20 }
0x18d3   :  { %1841 = vtanh.f32 %v1257_v42 }
0x18d4   :  { %1843 = vpow2.f32 %v1688_v53 }
0x18d9   :  { %v1842_v43 = vpop.eup %1841 }
0x18da   :  { %1261 = vrot.lane.b32.xlu1 %v1842_v43, %s1890_s22  ;;  %v1844_v34 = vpop.eup %1843 }
0x18db   :  { %v793_v54 = vadd.f32 1.0, %v1844_v34 }
0x18dd   :  { %1845 = vrcp.f32 %v793_v54  ;;  %v805_v56 = vand.u32 2147483648, %v793_v54  ;;  %vm799_vm2 = vweird.f32 %v793_v54  ;;  %v803_v0 = vand.u32 2147483647, %v793_v54 }
0x18df   :  { %v806_v25 = vor.u32 1.1754944e-38, %v805_v56  ;;  %vm804_vm4 = vcmp.eq.f32.partialorder %v803_v0, 8.507059e+37 }
0x18e2   :  { %811 = vrot.lane.b32.xlu1 %v809_v44, %s1888_s16 }
0x18e3   :  { %v1846_v32 = vpop.eup %1845 }
0x18e4   :  { %v795_v57 = vmul.f32 %v1846_v32, %v793_v54  ;;  %vm800_vm1 = vweird.f32 %v1846_v32 }
0x18e5   :  { %vm801_vm3 = vmor %vm799_vm2, %vm800_vm1 }
0x18e6   :  { %v796_v58 = vsub.f32 1.0, %v795_v57 }
0x18e8   :  { %v797_v27 = vmul.f32 %v1846_v32, %v796_v58 }
0x18ea   :  { %v798_v62 = vadd.f32 %v1846_v32, %v797_v27 }
0x18ec   :  { %v802_v30 = vsel %vm801_vm3, %v1846_v32, %v798_v62 }
0x18ed   :  { %v807_v1 = vsel %vm804_vm4, %v806_v25, %v802_v30 }
0x18ee   :  { %v821_v40 = vsub.f32 1.0, %v807_v1  ;;  %v827_v42 = vmul.f32 %v807_v1, %v2209_v10 }
0x194c   :  { %v1262_v23 = vpop.permute.xlu1 %1261 }
0x194d   :  { %v1264_v47 = vmul.f32 %v1262_v23, %v1259_v17 }
0x194f   :  { %v2286_v48 = vadd.f32 %v1265_v45, %v1264_v47 }
0x1951   :  { %v1273_v49 = vpack.c.bf16 %v2286_v48, %v2286_v48 }
0x1953   :  { %1275 = vrot.lane.b32.xlu2 %v1273_v49, %s1890_s22 }
0x1954   :  { %v812_v59 = vpop.permute.xlu1 %811 }
0x1955   :  { %v814_v4 = vmul.f32 %v812_v59, %v807_v1 }
0x19ad   :  { %v1276_v50 = vpop.permute.xlu2 %1275 }
0x19ae   :  { %1720 = vmatmul.msk.bf16.vlgmr.msrb.gmra.mxu2 %vm290_vm12, %v1276_v50 }
0x1a31   :  { %v1289_v9 = vpop.f32.mrf.mxu2 }
0x1a32   :  { %v1313_v61 = vadd.f32 %v1289_v9, %v2191_v18  ;;  %v1293_v11 = vadd.f32 %v1289_v9, %v902_v8 }
0x1a34   :  { %1315 = vrot.lane.b32.xlu0 %v1313_v61, %s1888_s16  ;;  %v1721_v12 = vmul.f32 -1.442695, %v1293_v11 }
0x1a36   :  { %1847 = vpow2.f32 %v1721_v12 }
0x1a39   :  { %v1291_v2 = vpop.f32.mrf.mxu2 }
0x1a3c   :  { %816 = vrot.lane.b32.xlu0 %v814_v4, %s1888_s16  ;;  %v1848_v16 = vpop.eup %1847 }
0x1a3d   :  { %v1297_v13 = vadd.f32 1.0, %v1848_v16 }
0x1a3f   :  { %1849 = vrcp.f32 %v1297_v13  ;;  %v1309_v26 = vand.u32 2147483648, %v1297_v13  ;;  %vm1303_vm6 = vweird.f32 %v1297_v13  ;;  %v1307_v28 = vand.u32 2147483647, %v1297_v13 }
0x1a41   :  { %v1310_v31 = vor.u32 1.1754944e-38, %v1309_v26  ;;  %vm1308_vm8 = vcmp.eq.f32.partialorder %v1307_v28, 8.507059e+37 }
0x1a45   :  { %v1850_v14 = vpop.eup %1849 }
0x1a46   :  { %v1299_v15 = vmul.f32 %v1850_v14, %v1297_v13  ;;  %vm1304_vm5 = vweird.f32 %v1850_v14 }
0x1a47   :  { %vm1305_vm7 = vmor %vm1303_vm6, %vm1304_vm5 }
0x1a48   :  { %v1300_v20 = vsub.f32 1.0, %v1299_v15 }
0x1a4a   :  { %v1301_v21 = vmul.f32 %v1850_v14, %v1300_v20 }
0x1a4c   :  { %v1302_v24 = vadd.f32 %v1850_v14, %v1301_v21 }
0x1a4e   :  { %v1306_v29 = vsel %vm1305_vm7, %v1850_v14, %v1302_v24 }
0x1a4f   :  { %v1311_v60 = vsel %vm1308_vm8, %v1310_v31, %v1306_v29 }
0x1a50   :  { %v1325_v23 = vsub.f32 1.0, %v1311_v60  ;;  %v1331_v47 = vmul.f32 %v1311_v60, %v2286_v48 }
0x1aa6   :  { %v1316_v33 = vpop.permute.xlu0 %1315 }
0x1aa7   :  { %v1318_v35 = vmul.f32 %v1316_v33, %v1311_v60 }
0x1aa9   :  { %1320 = vrot.lane.b32.xlu2 %v1318_v35, %s1888_s16 }
0x1aae   :  { %v817_v3 = vpop.permute.xlu0 %816 }
0x1aaf   :  { %v819_v36 = vadd.f32 %v817_v3, %v258_v51 }
0x1ab1   :  { %1851 = vtanh.f32 %v819_v36 }
0x1ab7   :  { %v1852_v37 = vpop.eup %1851 }
0x1ab8   :  { %823 = vrot.lane.b32.xlu2 %v1852_v37, %s1890_s22 }
0x1b03   :  { %v1321_v7 = vpop.permute.xlu2 %1320 }
0x1b04   :  { %v1323_v38 = vadd.f32 %v1321_v7, %v902_v8 }
0x1b06   :  { %1853 = vtanh.f32 %v1323_v38 }
0x1b0c   :  { %v1854_v39 = vpop.eup %1853 }
0x1b0d   :  { %1327 = vrot.lane.b32.xlu1 %v1854_v39, %s1890_s22 }
0x1b12   :  { %v824_v41 = vpop.permute.xlu2 %823 }
0x1b13   :  { %v826_v43 = vmul.f32 %v824_v41, %v821_v40 }
0x1b15   :  { %v828_v44 = vadd.f32 %v827_v42, %v826_v43  ;;  %762 = vrot.lane.b32.xlu1 %v2209_v10, %s1890_s22 }
0x1b17   :  { %830 = vrot.lane.b32.xlu2 %v828_v44, %s1890_s22 }
0x1b71   :  { %v831_v17 = vpop.permute.xlu2 %830 }
0x1b72   :  { %834 = vst.msk [vmem:[#allocation3 + $0x38] sm:$0xff] %vm290_vm12, %v831_v17 }
0x1b73   :  { %835 = vst.msk [vmem:[%s2409_s14] sm:$0xff] %vm290_vm12, %v831_v17 }
0x1b79   :  { %v843_v52 = vld [vmem:[#allocation3 + $0x38] sm:$0xff] }
0x1b7f   :  { %v1328_v45 = vpop.permute.xlu1 %1327 }
0x1b80   :  { %v1330_v49 = vmul.f32 %v1328_v45, %v1325_v23 }
0x1b82   :  { %v1332_v50 = vadd.f32 %v1331_v47, %v1330_v49 }
0x1b84   :  { %v1339_v46 = vpack.c.bf16 %v1332_v50, %v1332_v50 }
0x1b86   :  { %1341 = vrot.lane.b32.xlu0 %v1339_v46, %s1890_s22 }
0x1b87   :  { %v763_v10 = vpop.permute.xlu1 %762 }
0x1b88   :  { %766 = vst.msk [vmem:[#allocation3 + $0x30] sm:$0xff] %vm290_vm12, %v763_v10  ;;  %v1755_v10 = vld [vmem:[%s2410_s11 + $0x8] sm:$0xff] }
0x1b89   :  { %1522 = vmatpush.bf16.msra.mxu2 %v1755_v10  ;;  %1756 = vmatpush.bf16.msra.mxu3 %v1755_v10 }
0x1b8f   :  { %v842_v51 = vld [vmem:[#allocation3 + $0x30] sm:$0xff] }
0x1b90   :  { %v847_v53 = vpack.c.bf16 %v843_v52, %v842_v51  ;;  %v1754_v51 = vld [vmem:[%s2410_s11] sm:$0xff] }
0x1b91   :  { %1523 = vmatpush.bf16.msra.mxu2 %v1754_v51  ;;  %1757 = vmatpush.bf16.msra.mxu3 %v1754_v51 }
0x1b92   :  { %1700 = vmatmul.msk.bf16.gmra.mxu1 %vm290_vm12, %v847_v53 }
0x1bf8   :  { %v1342_v34 = vpop.permute.xlu0 %1341 }
0x1bf9   :  { %1722 = vmatmul.msk.bf16.vlgmr.msrb.gmra.mxu3 %vm290_vm12, %v1342_v34 }
0x1c0f   :  { %v904_v58 = vpop.f32.mrf.mxu1 }
0x1c10   :  { %v905_v27 = vadd.f32 %v2198_v22, %v904_v58 }
0x1c17   :  { %v906_v3 = vpop.f32.mrf.mxu1 }
0x1c18   :  { %v907_v36 = vadd.f32 %v2198_v22, %v906_v3 }
0x1c7c   :  { %v1355_v54 = vpop.f32.mrf.mxu3 }
0x1c7d   :  { %v1379_v32 = vadd.f32 %v1355_v54, %v2191_v18  ;;  %v1359_v9 = vadd.f32 %v1355_v54, %v905_v27 }
0x1c7f   :  { %1381 = vrot.lane.b32.xlu0 %v1379_v32, %s1888_s16  ;;  %v1723_v62 = vmul.f32 -1.442695, %v1359_v9 }
0x1c81   :  { %1855 = vpow2.f32 %v1723_v62 }
0x1c84   :  { %v1357_v57 = vpop.f32.mrf.mxu3 }
0x1c87   :  { %v1856_v61 = vpop.eup %1855 }
0x1c88   :  { %v1363_v56 = vadd.f32 1.0, %v1856_v61 }
0x1c8a   :  { %1857 = vrcp.f32 %v1363_v56  ;;  %v1375_v2 = vand.u32 2147483648, %v1363_v56  ;;  %vm1369_vm10 = vweird.f32 %v1363_v56  ;;  %v1373_v4 = vand.u32 2147483647, %v1363_v56 }
0x1c8c   :  { %v1376_v8 = vor.u32 1.1754944e-38, %v1375_v2  ;;  %vm1374_vm13 = vcmp.eq.f32.partialorder %v1373_v4, 8.507059e+37 }
0x1c90   :  { %v1858_v0 = vpop.eup %1857 }
0x1c91   :  { %v1365_v30 = vmul.f32 %v1858_v0, %v1363_v56  ;;  %vm1370_vm9 = vweird.f32 %v1858_v0 }
0x1c92   :  { %vm1371_vm11 = vmor %vm1369_vm10, %vm1370_vm9 }
0x1c93   :  { %v1366_v25 = vsub.f32 1.0, %v1365_v30 }
0x1c95   :  { %v1367_v59 = vmul.f32 %v1858_v0, %v1366_v25 }
0x1c97   :  { %v1368_v1 = vadd.f32 %v1858_v0, %v1367_v59 }
0x1c99   :  { %v1372_v5 = vsel %vm1371_vm11, %v1858_v0, %v1368_v1 }
0x1c9a   :  { %v1377_v12 = vsel %vm1374_vm13, %v1376_v8, %v1372_v5 }
0x1c9b   :  { %v1391_v20 = vsub.f32 1.0, %v1377_v12  ;;  %v1397_v24 = vmul.f32 %v1377_v12, %v1332_v50 }
0x1cf1   :  { %v1382_v11 = vpop.permute.xlu0 %1381 }
0x1cf2   :  { %v1384_v16 = vmul.f32 %v1382_v11, %v1377_v12 }
0x1cf4   :  { %1386 = vrot.lane.b32.xlu1 %v1384_v16, %s1888_s16 }
0x1d66   :  { %v1387_v13 = vpop.permute.xlu1 %1386 }
0x1d67   :  { %v1389_v14 = vadd.f32 %v1387_v13, %v905_v27 }
0x1d69   :  { %1859 = vtanh.f32 %v1389_v14 }
0x1d6f   :  { %v1860_v15 = vpop.eup %1859 }
0x1d70   :  { %1393 = vrot.lane.b32.xlu2 %v1860_v15, %s1890_s22 }
0x1dca   :  { %v1394_v21 = vpop.permute.xlu2 %1393 }
0x1dcb   :  { %v1396_v26 = vmul.f32 %v1394_v21, %v1391_v20  ;;  %v1770_v20 = vld [vmem:[%s2411_s12] ss:$0 sm:$0xff] }
0x1dcd   :  { %v2323_v28 = vadd.f32 %v1397_v24, %v1396_v26 }
0x1dcf   :  { %v1405_v29 = vpack.c.bf16 %v2323_v28, %v2323_v28 }
0x1dd1   :  { %1407 = vrot.lane.b32.xlu0 %v1405_v29, %s1890_s22 }
0x1e43   :  { %v1408_v31 = vpop.permute.xlu0 %1407 }
0x1e44   :  { %1724 = vmatmul.msk.bf16.vlgmr.msrb.gmra.mxu0 %vm290_vm12, %v1408_v31 }
0x1ec1   :  { %v1421_v33 = vpop.f32.mrf.mxu0 }
0x1ec2   :  { %v1445_v60 = vadd.f32 %v1421_v33, %v2191_v18  ;;  %v1425_v37 = vadd.f32 %v1421_v33, %v907_v36 }
0x1ec4   :  { %1447 = vrot.lane.b32.xlu1 %v1445_v60, %s1888_s16  ;;  %v1725_v7 = vmul.f32 -1.442695, %v1425_v37 }
0x1ec6   :  { %1861 = vpow2.f32 %v1725_v7 }
0x1ec9   :  { %v1423_v35 = vpop.f32.mrf.mxu0 }
0x1ecc   :  { %1004 = vrot.lane.b32.xlu1 %v2214_v19, %s1890_s22  ;;  %v1862_v38 = vpop.eup %1861 }
0x1ecd   :  { %v1429_v39 = vadd.f32 1.0, %v1862_v38 }
0x1ecf   :  { %1863 = vrcp.f32 %v1429_v39  ;;  %v1441_v19 = vand.u32 2147483648, %v1429_v39  ;;  %vm1435_vm15 = vweird.f32 %v1429_v39  ;;  %v1439_v44 = vand.u32 2147483647, %v1429_v39 }
0x1ed1   :  { %v1442_v23 = vor.u32 1.1754944e-38, %v1441_v19  ;;  %vm1440_vm1 = vcmp.eq.f32.partialorder %v1439_v44, 8.507059e+37 }
0x1ed4   :  { %1334 = vrot.lane.b32.xlu1 %v1332_v50, %s1890_s22 }
0x1ed5   :  { %v1864_v18 = vpop.eup %1863 }
0x1ed6   :  { %v1431_v40 = vmul.f32 %v1864_v18, %v1429_v39  ;;  %vm1436_vm14 = vweird.f32 %v1864_v18 }
0x1ed7   :  { %vm1437_vm0 = vmor %vm1435_vm15, %vm1436_vm14 }
0x1ed8   :  { %v1432_v41 = vsub.f32 1.0, %v1431_v40 }
0x1eda   :  { %v1433_v42 = vmul.f32 %v1864_v18, %v1432_v41 }
0x1edc   :  { %1400 = vrot.lane.b32.xlu1 %v2323_v28, %s1890_s22  ;;  %v1434_v43 = vadd.f32 %v1864_v18, %v1433_v42 }
0x1ede   :  { %v1438_v17 = vsel %vm1437_vm0, %v1864_v18, %v1434_v43 }
0x1edf   :  { %v1443_v45 = vsel %vm1440_vm1, %v1442_v23, %v1438_v17 }
0x1ee0   :  { %v1457_v58 = vsub.f32 1.0, %v1443_v45  ;;  %v1463_v9 = vmul.f32 %v1443_v45, %v2323_v28 }
0x1f36   :  { %v1448_v22 = vpop.permute.xlu1 %1447 }
0x1f37   :  { %v1450_v47 = vmul.f32 %v1448_v22, %v1443_v45 }
0x1f39   :  { %1452 = vrot.lane.b32.xlu2 %v1450_v47, %s1888_s16 }
0x1f3e   :  { %v1005_v49 = vpop.permute.xlu1 %1004 }
0x1f3f   :  { %1007 = vst.msk [vmem:[#allocation3] sm:$0xff] %vm290_vm12, %v1005_v49 }
0x1f41   :  { %1070 = vrot.lane.b32.xlu2 %v2238_v55, %s1890_s22 }
0x1f46   :  { %v1335_v50 = vpop.permute.xlu1 %1334  ;;  %v1472_v54 = vld [vmem:[#allocation3] sm:$0xff] }
0x1f47   :  { %1337 = vst.msk [vmem:[#allocation3 + $0x28] sm:$0xff] %vm290_vm12, %v1335_v50 }
0x1f49   :  { %1136 = vrot.lane.b32.xlu2 %v2252_v6, %s1890_s22 }
0x1f4e   :  { %v1401_v46 = vpop.permute.xlu1 %1400  ;;  %v1477_v25 = vld [vmem:[#allocation3 + $0x28] sm:$0xff] }
0x1f4f   :  { %1403 = vst.msk [vmem:[#allocation3 + $0x30] sm:$0xff] %vm290_vm12, %v1401_v46 }
0x1f56   :  { %v1478_v4 = vld [vmem:[#allocation3 + $0x30] sm:$0xff] }
0x1f93   :  { %v1453_v55 = vpop.permute.xlu2 %1452 }
0x1f94   :  { %v1455_v52 = vadd.f32 %v1453_v55, %v907_v36 }
0x1f96   :  { %1865 = vtanh.f32 %v1455_v52 }
0x1f9b   :  { %v1071_v53 = vpop.permute.xlu2 %1070 }
0x1f9c   :  { %v1866_v6 = vpop.eup %1865  ;;  %1073 = vst.msk [vmem:[#allocation3 + $0x8] sm:$0xff] %vm290_vm12, %v1071_v53 }
0x1f9d   :  { %1459 = vrot.lane.b32.xlu0 %v1866_v6, %s1890_s22 }
0x1fa3   :  { %v1137_v34 = vpop.permute.xlu2 %1136  ;;  %v1473_v32 = vld [vmem:[#allocation3 + $0x8] sm:$0xff] }
0x1fa4   :  { %1139 = vst.msk [vmem:[#allocation3 + $0x10] sm:$0xff] %vm290_vm12, %v1137_v34  ;;  %v1480_v57 = vpack.c.bf16 %v1473_v32, %v1472_v54 }
0x1fa5   :  { %1268 = vrot.lane.b32.xlu0 %v2286_v48, %s1890_s22 }
0x1fa6   :  { %1735 = vmatmul.msk.bf16.vlgmr.msra.gmra.mxu2 %vm290_vm12, %v1480_v57 }
0x1fad   :  { %1202 = vrot.lane.b32.xlu0 %v2271_v63, %s1890_s22  ;;  %v1474_v63 = vld [vmem:[#allocation3 + $0x10] sm:$0xff] }
0x200f   :  { %v1460_v27 = vpop.permute.xlu0 %1459 }
0x2010   :  { %v1462_v62 = vmul.f32 %v1460_v27, %v1457_v58 }
0x2012   :  { %v1464_v61 = vadd.f32 %v1463_v9, %v1462_v62 }
0x2014   :  { %1466 = vrot.lane.b32.xlu2 %v1464_v61, %s1890_s22 }
0x2017   :  { %v1269_v56 = vpop.permute.xlu0 %1268 }
0x2018   :  { %1271 = vst.msk [vmem:[#allocation3 + $0x20] sm:$0xff] %vm290_vm12, %v1269_v56 }
0x201f   :  { %v1203_v0 = vpop.permute.xlu0 %1202  ;;  %v1476_v30 = vld [vmem:[#allocation3 + $0x20] sm:$0xff] }
0x2020   :  { %1205 = vst.msk [vmem:[#allocation3 + $0x18] sm:$0xff] %vm290_vm12, %v1203_v0  ;;  %v1482_v48 = vpack.c.bf16 %v1477_v25, %v1476_v30 }
0x2022   :  { %1737 = vmatmul.msk.bf16.vlgmr.msra.gmra.mxu3 %vm290_vm12, %v1482_v48 }
0x2027   :  { %v1475_v59 = vld [vmem:[#allocation3 + $0x18] sm:$0xff] }
0x2028   :  { %v1481_v1 = vpack.c.bf16 %v1475_v59, %v1474_v63 }
0x2029   :  { %v1525_v11 = vpop.f32.mrf.mxu2 }
0x202a   :  { %1736 = vmatmul.msk.bf16.gmra.mxu2 %vm290_vm12, %v1481_v1  ;;  %v1526_v31 = vadd.f32 %v1770_v20, %v1525_v11 }
0x2031   :  { %v1527_v16 = vpop.f32.mrf.mxu2 }
0x2032   :  { %v1528_v26 = vadd.f32 %v1770_v20, %v1527_v16 }
0x206e   :  { %v1467_v2 = vpop.permute.xlu2 %1466 }
0x206f   :  { %1469 = vst.msk [vmem:[#allocation3 + $0x38] sm:$0xff] %vm290_vm12, %v1467_v2 }
0x2070   :  { %1726 = vst.msk [vmem:[%s2409_s14 + $0x8] sm:$0xff] %vm290_vm12, %v1467_v2 }
0x2076   :  { %v1479_v5 = vld [vmem:[#allocation3 + $0x38] sm:$0xff] }
0x2077   :  { %v1483_v8 = vpack.c.bf16 %v1479_v5, %v1478_v4 }
0x2079   :  { %1738 = vmatmul.msk.bf16.gmra.mxu3 %vm290_vm12, %v1483_v8 }
0x20a5   :  { %v1535_v12 = vpop.f32.mrf.mxu3 }
0x20a6   :  { %v1536_v28 = vadd.f32 %v1770_v20, %v1535_v12 }
0x20a8   :  { %v1545_v37 = vmax.f32 %v1526_v31, %v1536_v28 }
0x20ad   :  { %v1537_v13 = vpop.f32.mrf.mxu3  ;;  %v1530_v14 = vpop.f32.mrf.mxu2 }
0x20ae   :  { %v1538_v21 = vadd.f32 %v1770_v20, %v1537_v13  ;;  %v1531_v60 = vadd.f32 %v1770_v20, %v1530_v14 }
0x20b0   :  { %v1546_v35 = vmax.f32 %v1528_v26, %v1538_v21 }
0x20b2   :  { %v1549_v39 = vmax.f32 %v1545_v37, %v1546_v35 }
0x20b5   :  { %v1532_v24 = vpop.f32.mrf.mxu2 }
0x20b6   :  { %v1533_v3 = vadd.f32 %v1770_v20, %v1532_v24 }
0x20fc   :  { %v1540_v15 = vpop.f32.mrf.mxu3 }
0x20fd   :  { %v1541_v29 = vadd.f32 %v1770_v20, %v1540_v15 }
0x20ff   :  { %v1547_v7 = vmax.f32 %v1531_v60, %v1541_v29 }
0x2104   :  { %v1542_v33 = vpop.f32.mrf.mxu3 }
0x2105   :  { %v1543_v36 = vadd.f32 %v1770_v20, %v1542_v33 }
0x2107   :  { %v1548_v38 = vmax.f32 %v1533_v3, %v1543_v36 }
0x2109   :  { %v1550_v18 = vmax.f32 %v1547_v7, %v1548_v38 }
0x210b   :  { %v1551_v40 = vmax.f32 %v1549_v39, %v1550_v18 }
0x210d   :  { %v1552_v41 = vsub.f32 %v1526_v31, %v1551_v40  ;;  %v1553_v42 = vsub.f32 %v1528_v26, %v1551_v40  ;;  %v1554_v43 = vsub.f32 %v1531_v60, %v1551_v40  ;;  %v1555_v19 = vsub.f32 %v1533_v3, %v1551_v40 }
0x210e   :  { %v1556_v23 = vsub.f32 %v1536_v28, %v1551_v40  ;;  %v1557_v45 = vsub.f32 %v1538_v21, %v1551_v40  ;;  %v1558_v49 = vsub.f32 %v1541_v29, %v1551_v40  ;;  %v1559_v46 = vsub.f32 %v1543_v36, %v1551_v40 }
0x210f   :  { %v1560_v44 = vmul.f32 1.442695, %v1552_v41  ;;  %v1562_v17 = vmul.f32 1.442695, %v1553_v42  ;;  %v1564_v22 = vmul.f32 1.442695, %v1554_v43 }
0x2110   :  { %v1566_v47 = vmul.f32 1.442695, %v1555_v19  ;;  %v1568_v50 = vmul.f32 1.442695, %v1556_v23  ;;  %v1570_v10 = vmul.f32 1.442695, %v1557_v45 }
0x2111   :  { %1867 = vpow2.f32 %v1560_v44  ;;  %v1572_v52 = vmul.f32 1.442695, %v1558_v49  ;;  %v1574_v34 = vmul.f32 1.442695, %v1559_v46 }
0x2112   :  { %1869 = vpow2.f32 %v1562_v17 }
0x2113   :  { %1871 = vpow2.f32 %v1564_v22 }
0x2114   :  { %1873 = vpow2.f32 %v1566_v47 }
0x2115   :  { %1875 = vpow2.f32 %v1568_v50 }
0x2116   :  { %1877 = vpow2.f32 %v1570_v10 }
0x2117   :  { %v1868_v51 = vpop.eup %1867  ;;  %1879 = vpow2.f32 %v1572_v52 }
0x2118   :  { %v1870_v55 = vpop.eup %1869  ;;  %1881 = vpow2.f32 %v1574_v34 }
0x2119   :  { %v1576_v53 = vadd.f32 %v1870_v55, %v1868_v51  ;;  %v1872_v6 = vpop.eup %1871 }
0x211a   :  { %v1874_v32 = vpop.eup %1873 }
0x211b   :  { %v1577_v54 = vadd.f32 %v1872_v6, %v1576_v53  ;;  %v1876_v58 = vpop.eup %1875 }
0x211c   :  { %v1878_v9 = vpop.eup %1877 }
0x211d   :  { %v1578_v57 = vadd.f32 %v1874_v32, %v1577_v54  ;;  %v1880_v61 = vpop.eup %1879 }
0x211e   :  { %v1882_v0 = vpop.eup %1881 }
0x211f   :  { %v1579_v27 = vadd.f32 %v1876_v58, %v1578_v57 }
0x2121   :  { %v1580_v62 = vadd.f32 %v1878_v9, %v1579_v27 }
0x2123   :  { %v1581_v56 = vadd.f32 %v1880_v61, %v1580_v62 }
0x2125   :  { %v1582_v30 = vadd.f32 %v1882_v0, %v1581_v56 }
0x2127   :  { %1883 = vlog2.f32 %v1582_v30 }
0x212d   :  { %v1884_v25 = vpop.eup %1883 }
0x212e   :  { %v1584_v48 = vmul.f32 0.6931472, %v1884_v25 }
0x2130   :  { %v1585_v63 = vsub.f32 %v1552_v41, %v1584_v48  ;;  %v1586_v59 = vsub.f32 %v1553_v42, %v1584_v48  ;;  %v1587_v1 = vsub.f32 %v1554_v43, %v1584_v48  ;;  %v1588_v2 = vsub.f32 %v1555_v19, %v1584_v48 }
0x2131   :  { %v1589_v4 = vsub.f32 %v1556_v23, %v1584_v48  ;;  %v1590_v5 = vsub.f32 %v1557_v45, %v1584_v48  ;;  %v1591_v8 = vsub.f32 %v1558_v49, %v1584_v48  ;;  %v1592_v11 = vsub.f32 %v1559_v46, %v1584_v48 }
0x2132   :  { %1593 = vst [vmem:[%s2412_s13] sm:$0xff] %v1585_v63 }
0x2133   :  { %1594 = vst [vmem:[%s2412_s13 + $0x8] sm:$0xff] %v1586_v59 }
0x2134   :  { %1595 = vst [vmem:[%s2412_s13 + $0x10] sm:$0xff] %v1587_v1 }
0x2135   :  { %1596 = vst [vmem:[%s2412_s13 + $0x18] sm:$0xff] %v1588_v2 }
0x2136   :  { %1597 = vst [vmem:[%s2412_s13 + $0x20] sm:$0xff] %v1589_v4 }
0x2137   :  { %1598 = vst [vmem:[%s2412_s13 + $0x28] sm:$0xff] %v1590_v5 }
0x2138   :  { %1599 = vst [vmem:[%s2412_s13 + $0x30] sm:$0xff] %v1591_v8 }
0x2139   :  { %1600 = vst [vmem:[%s2412_s13 + $0x38] sm:$0xff] %v1592_v11 }

</bundles_post_ra>
